<compile_context>
chip_gen: v7x
topology: tpu7x:2x2x1
jax: 0.10.0
libtpu: 0.0.40
codegen_flags: <defaults>
</compile_context>

<pallas_src>
import functools
import math

import jax
import jax.numpy as jnp
import numpy as np
from jax.experimental import pallas as pl
from jax.experimental.pallas import tpu as pltpu

EPS = 1e-6                 # Conv2dMod default eps
RGB_PAD = 128              # lane-dense padding of the 3 RGB output channels
SEG_ALIGN = 128            # 128-lane alignment of every style segment
_DN = (((1,), (1,)), ((), ()))          # x @ w.T (contract last dims of both)
_DN_GATHER = (((1,), (0,)), ((), ()))   # gather @ x


def _round_up(x, m):
    return (x + m - 1) // m * m


def _gelu_exact(x):
    """GELU matching torch.nn.GELU(approximate='none').

    # TODO(synk): lax.erf lowering is not guaranteed in Mosaic; erf is
    # evaluated with the Abramowitz & Stegun 7.1.26 rational approximation
    # (max abs error ~1.5e-7) using only exp / VPU ops.
    """
    z = x * 0.7071067811865476              # x / sqrt(2)
    az = jnp.abs(z)
    t = 1.0 / (1.0 + 0.3275911 * az)
    poly = t * (0.254829592 + t * (-0.284496736 + t * (1.421413741
               + t * (-1.453152027 + t * 1.061405429))))
    erf_abs = 1.0 - poly * jnp.exp(-az * az)
    erf = jnp.where(z >= 0.0, erf_abs, -erf_abs)
    return 0.5 * x * (1.0 + erf)


# ------------------------------ fused kernel -------------------------------

def _generator_kernel(y_ref, a_ref, w_ref, misc_ref, g_ref, o_ref, *,
                      nb, NP, C0, SEG):
    """Entire Generator forward in one kernel invocation.

    y_ref    : (NP, S+1)           per-pixel styles, ones column appended
    a_ref    : (3*nb*SEG+128, S+1) all affines, bias folded as last column,
                                   each segment 128-lane aligned
    w_ref    : ((2nb+1)*C0+128,C0) [w2_b|w3_b]*nb | conv_w(pad) | rgb_w(pad)
    misc_ref : (16*nb+8+NP, C0)    per block [9 dw taps|ssq1|ssq2|ssq3|0*4],
                                   then conv bias (8 rows), then x0 (NP rows)
    g_ref    : (9*NP, NP)          0/1 replicate-pad 3x3 tap-gather matrix
    o_ref    : (NP, 128)           tanh(rgb), channels 3.. are exactly zero
    """
    f32 = jnp.float32

    x = misc_ref[16 * nb + 8: 16 * nb + 8 + NP, :]          # (NP, C0) = x0
    gather = g_ref[...]                                      # (9*NP, NP)

    # One matmul for every style affine (2 blocks x 3 + padded ToRGB);
    # the ones column of y carries the affine biases.
    s_all = jax.lax.dot_general(y_ref[...], a_ref[...], _DN,
                                preferred_element_type=f32)  # (NP, 3nb*SEG+128)

    for b in range(nb):
        mrow = 16 * b
        w_dw = misc_ref[mrow: mrow + 9, :]                   # (9, C0)
        ssq1 = misc_ref[mrow + 9: mrow + 10, :]              # (1, C0) precomputed
        ssq2 = misc_ref[mrow + 10: mrow + 11, :]
        ssq3 = misc_ref[mrow + 11: mrow + 12, :]
        w2 = w_ref[2 * b * C0: (2 * b + 1) * C0, :]          # (C0, C0)
        w3 = w_ref[(2 * b + 1) * C0: (2 * b + 2) * C0, :]

        off = 3 * b * SEG                                    # 128-aligned starts
        s1 = s_all[:, off: off + C0]
        s2 = s_all[:, off + SEG: off + SEG + C0]
        s3 = s_all[:, off + 2 * SEG: off + 2 * SEG + C0]

        # --- c1: modulated depthwise 3x3 conv, replicate pad, demodulation.
        # Replicate pad + 3x3 neighbourhood = one MXU gather-matmul; the 9
        # per-tap per-channel weights are applied as scale-accumulates.
        taps = jax.lax.dot_general(gather, x, _DN_GATHER,
                                   preferred_element_type=f32)  # (9*NP, C0)
        acc = taps[0:NP, :] * w_dw[0:1, :]
        for t in range(1, 9):
            acc = acc + taps[t * NP:(t + 1) * NP, :] * w_dw[t:t + 1, :]
        m1 = 1.0 + s1
        x = acc * (m1 * jax.lax.rsqrt(m1 * m1 * ssq1 + EPS))

        # --- c2: modulated 1x1 conv (demod); per-output-channel scale
        # factored out of the matmul (see header note).
        m2 = 1.0 + s2
        x = jax.lax.dot_general(x, w2, _DN, preferred_element_type=f32)
        x = x * (m2 * jax.lax.rsqrt(m2 * m2 * ssq2 + EPS))

        # --- GELU (erf), fused in-kernel.
        x = _gelu_exact(x)

        # --- c3: modulated 1x1 conv (demod).
        m3 = 1.0 + s3
        x = jax.lax.dot_general(x, w3, _DN, preferred_element_type=f32)
        x = x * (m3 * jax.lax.rsqrt(m3 * m3 * ssq3 + EPS))

    # GeneratorBlock.conv: plain 1x1 conv + bias (weights zero-padded C1->C0,
    # so channels >= C1 of xc are exactly zero).
    conv_w = w_ref[2 * nb * C0: (2 * nb + 1) * C0, :]        # (C0, C0)
    rgb_w = w_ref[(2 * nb + 1) * C0: (2 * nb + 1) * C0 + RGB_PAD, :]  # (128,C0)
    conv_b = misc_ref[16 * nb: 16 * nb + 1, :]               # (1, C0)
    xc = jax.lax.dot_general(x, conv_w, _DN,
                             preferred_element_type=f32) + conv_b

    # ToRGB (no demodulation) + Generator tanh.  Output channels are padded
    # to 128 so the single store is lane-dense (cols 3.. are exactly zero).
    srgb = s_all[:, 3 * nb * SEG: 3 * nb * SEG + RGB_PAD]    # (NP, 128)
    rgb = jax.lax.dot_general(xc, rgb_w, _DN,
                              preferred_element_type=f32)    # (NP, 128)
    o_ref[...] = jnp.tanh(rgb * (1.0 + srgb))


# ------------------------- one-time weight packing -------------------------

def _build_tap_gather(n, h, w):
    """0/1 matrix G (9*N*P, N*P): row t*N*P + r selects the replicate-padded
    3x3 neighbour (tap t = ky*3+kx) of flattened position r, per sample."""
    p = h * w
    rows = n * p
    g = np.zeros((9 * rows, rows), np.float32)
    for t in range(9):
        ky, kx = divmod(t, 3)
        for ni in range(n):
            for hi in range(h):
                for wi in range(w):
                    hs = min(max(hi + ky - 1, 0), h - 1)
                    ws = min(max(wi + kx - 1, 0), w - 1)
                    g[t * rows + ni * p + hi * w + wi,
                      ni * p + hs * w + ws] = 1.0
    return jnp.asarray(g)


def _pack_params(params, batch_size):
    """One-time (eager) packing of every style-independent tensor into a few
    VMEM-friendly slabs.  Runs OUTSIDE the jitted per-call path."""
    n = batch_size
    h = w = 4                              # the Generator always starts at 4x4
    p = h * w
    NP = n * p
    c0 = params["initial"].shape[1]        # block channels
    c1 = params["conv_w"].shape[0]         # GeneratorBlock.conv out channels
    s = params["rgb_a_w"].shape[1]         # style_dim
    nb = len(params["blocks"])
    assert c1 <= c0, "kernel assumes conv output channels <= block channels"
    SEG = _round_up(c0, SEG_ALIGN)         # 128-aligned style segment width
    f32 = jnp.float32

    def aug(wt, bias, rows):
        # [weight | bias] padded with zero rows to `rows` -> (rows, S+1)
        blk = jnp.concatenate([wt.astype(f32), bias.astype(f32)[:, None]], 1)
        pad = rows - blk.shape[0]
        if pad:
            blk = jnp.concatenate([blk, jnp.zeros((pad, s + 1), f32)], 0)
        return blk

    # (a) all 7 style affines, each segment padded to a 128-lane boundary.
    a_parts = []
    for blk in params["blocks"]:
        a_parts += [aug(blk["a1_w"], blk["a1_b"], SEG),
                    aug(blk["a2_w"], blk["a2_b"], SEG),
                    aug(blk["a3_w"], blk["a3_b"], SEG)]
    a_parts.append(aug(params["rgb_a_w"], params["rgb_a_b"], RGB_PAD))
    a_slab = jnp.concatenate(a_parts, axis=0)            # (3*nb*SEG+128, S+1)

    # (b) every 1x1 weight row-stacked at width C0.
    w_parts = []
    for blk in params["blocks"]:
        w_parts += [blk["c2_w"][:, :, 0, 0].astype(f32),
                    blk["c3_w"][:, :, 0, 0].astype(f32)]
    conv_w = jnp.zeros((c0, c0), f32).at[:c1, :].set(params["conv_w"][:, :, 0, 0])
    rgb_w = jnp.zeros((RGB_PAD, c0), f32).at[:3, :c1].set(
        params["rgb_c_w"][:, :, 0, 0])
    w_parts += [conv_w, rgb_w]
    w_slab = jnp.concatenate(w_parts, axis=0)            # ((2nb+1)*C0+128, C0)

    # (c) misc slab at width C0: per block [9 dw taps | ssq1 | ssq2 | ssq3 | 0],
    #     then conv bias (8-row section), then the expanded initial_param.
    misc_parts = []
    for blk in params["blocks"]:
        w_dw = jnp.transpose(blk["c1_w"][:, 0].reshape(c0, 9), (1, 0)).astype(f32)
        w2 = blk["c2_w"][:, :, 0, 0].astype(f32)
        w3 = blk["c3_w"][:, :, 0, 0].astype(f32)
        ssq1 = jnp.sum(w_dw * w_dw, axis=0, keepdims=True)
        ssq2 = jnp.sum(w2 * w2, axis=1)[None, :]
        ssq3 = jnp.sum(w3 * w3, axis=1)[None, :]
        misc_parts.append(jnp.concatenate(
            [w_dw, ssq1, ssq2, ssq3, jnp.zeros((4, c0), f32)], axis=0))  # (16,C0)
    conv_b = jnp.zeros((8, c0), f32).at[0, :c1].set(params["conv_b"])
    misc_parts.append(conv_b)
    x0 = jnp.transpose(params["initial"][0], (1, 2, 0)).reshape(p, c0).astype(f32)
    misc_parts.append(jnp.tile(x0, (n, 1)))              # (NP, C0)
    misc_slab = jnp.concatenate(misc_parts, axis=0)      # (16*nb+8+NP, C0)

    gather = _build_tap_gather(n, h, w)                  # (9*NP, NP)

    packed = dict(a_slab=a_slab, w_slab=w_slab,
                  misc_slab=misc_slab, gather=gather)
    dims = dict(nb=nb, NP=NP, C0=c0, SEG=SEG, P=p)
    return packed, dims


# ----------------------------- jitted wrapper -------------------------------

def make_generator(params, batch_size):
    """Packs the weights once and returns a jitted callable
    styles(N, style_dim) -> rgb(N, 3, 4, 4)."""
    packed, dims = _pack_params(params, batch_size)
    nb, NP, C0, SEG, P = (dims["nb"], dims["NP"], dims["C0"],
                          dims["SEG"], dims["P"])

    kern = functools.partial(_generator_kernel, nb=nb, NP=NP, C0=C0, SEG=SEG)
    vmem = pl.BlockSpec(memory_space=pltpu.MemorySpace.VMEM)

    # TODO(synk): if this generator is called many times back-to-back, the 4
    # constant slabs (~300 KiB) could be kept VMEM-resident across calls
    # (cross-call future / get_global pattern) so only `styles` is DMA'd.
    @jax.jit
    def fwd(packed, styles):
        n = styles.shape[0]
        assert n * P == NP, "batch size is baked into the packed constants"
        # Only style-dependent glue lives in the per-call jitted path.
        y_rep = jnp.repeat(styles.astype(jnp.float32), P, axis=0)     # (NP, S)
        y_aug = jnp.concatenate(
            [y_rep, jnp.ones((NP, 1), jnp.float32)], axis=1)          # (NP, S+1)
        out = pl.pallas_call(
            kern,
            out_shape=jax.ShapeDtypeStruct((NP, RGB_PAD), jnp.float32),
            in_specs=[vmem] * 5,
            out_specs=vmem,
        )(y_aug, packed["a_slab"], packed["w_slab"], packed["misc_slab"],
          packed["gather"])
        rgb = out[:, :3].reshape(n, 4, 4, 3)                          # NHWC
        return jnp.transpose(rgb, (0, 3, 1, 2))                       # NCHW

    return functools.partial(fwd, packed)


# --------------------------- parameter creation ----------------------------

def init_params(key, initial_channels, style_dim, num_layers_per_block):
    C0 = initial_channels
    C1 = max(C0 // 2, 32)
    S = style_dim
    keys = iter(jax.random.split(key, 64))

    def nrm(shape, scale=1.0):
        return scale * jax.random.normal(next(keys), shape, jnp.float32)

    params = {"initial": nrm((1, C0, 4, 4))}
    blocks = []
    for _ in range(num_layers_per_block):
        blocks.append(dict(
            a1_w=nrm((C0, S), 1.0 / math.sqrt(S)), a1_b=nrm((C0,), 0.05),
            c1_w=nrm((C0, 1, 3, 3), math.sqrt(2.0 / 9.0)),          # depthwise
            a2_w=nrm((C0, S), 1.0 / math.sqrt(S)), a2_b=nrm((C0,), 0.05),
            c2_w=nrm((C0, C0, 1, 1), math.sqrt(2.0 / C0)),
            a3_w=nrm((C0, S), 1.0 / math.sqrt(S)), a3_b=nrm((C0,), 0.05),
            c3_w=nrm((C0, C0, 1, 1), math.sqrt(2.0 / C0)),
        ))
    params["blocks"] = blocks
    params["conv_w"] = nrm((C1, C0, 1, 1), 1.0 / math.sqrt(C0))
    params["conv_b"] = nrm((C1,), 0.05)
    params["rgb_a_w"] = nrm((3, S), 1.0 / math.sqrt(S))
    params["rgb_a_b"] = nrm((3,), 0.05)
    params["rgb_c_w"] = nrm((3, C1, 1, 1), 1.0 / math.sqrt(C1))
    return params, C0, C1


if __name__ == "__main__":
    # Small, module-consistent shapes: batch=2, initial_channels=64,
    # style_dim=32, spatial 4x4 (the Generator always starts at 4x4).
    N, initial_channels, style_dim = 2, 64, 32

    key = jax.random.PRNGKey(0)
    pkey, skey = jax.random.split(key)
    params, C0, C1 = init_params(pkey, initial_channels, style_dim,
                                 num_layers_per_block=2)
    styles = jax.random.normal(skey, (N, style_dim), jnp.float32)

    fwd = make_generator(params, batch_size=N)    # one-time weight packing
    out = jax.block_until_ready(fwd(styles))      # compile + run
    out = jax.block_until_ready(fwd(styles))      # steady-state (no repacking)

    assert out.shape == (N, 3, 4, 4), out.shape
    assert out.dtype == jnp.float32
    assert bool(jnp.all(jnp.isfinite(out)))
    assert bool(jnp.all(jnp.abs(out) <= 1.0))     # tanh range
    print("KERNEL_OK")
</pallas_src>

<mosaic_0001>
module attributes {stable_mosaic.version = 11 : i64} {
  func.func @_generator_kernel(%arg0: memref<32x33xf32, #tpu.memory_space<vmem>>, %arg1: memref<896x33xf32, #tpu.memory_space<vmem>>, %arg2: memref<448x64xf32, #tpu.memory_space<vmem>>, %arg3: memref<72x64xf32, #tpu.memory_space<vmem>>, %arg4: memref<288x32xf32, #tpu.memory_space<vmem>>, %arg5: memref<32x128xf32, #tpu.memory_space<vmem>>) attributes {dimension_semantics = [], scalar_prefetch = 0 : i64, scratch_operands = 0 : i64, tpu.core_type = #tpu.core_type<tc>} {
    %c40 = arith.constant 40 : index
    %c0 = arith.constant 0 : index
    %0 = vector.load %arg3[%c40, %c0] : memref<72x64xf32, #tpu.memory_space<vmem>>, vector<32x64xf32>
    %c0_0 = arith.constant 0 : index
    %c0_1 = arith.constant 0 : index
    %1 = vector.load %arg4[%c0_0, %c0_1] : memref<288x32xf32, #tpu.memory_space<vmem>>, vector<288x32xf32>
    %c0_2 = arith.constant 0 : index
    %c0_3 = arith.constant 0 : index
    %2 = vector.load %arg0[%c0_2, %c0_3] : memref<32x33xf32, #tpu.memory_space<vmem>>, vector<32x33xf32>
    %c0_4 = arith.constant 0 : index
    %c0_5 = arith.constant 0 : index
    %3 = vector.load %arg1[%c0_4, %c0_5] : memref<896x33xf32, #tpu.memory_space<vmem>>, vector<896x33xf32>
    %cst = arith.constant dense<0.000000e+00> : vector<32x896xf32>
    %4 = tpu.matmul %2, %3, %cst {dimension_numbers = #tpu.dot_dimension_numbers<[1], [1], [0], [0], [0, 0, 1, 0], [], []>} : vector<32x33xf32>, vector<896x33xf32>, vector<32x896xf32> -> vector<32x896xf32>
    %c0_6 = arith.constant 0 : index
    %c0_7 = arith.constant 0 : index
    %5 = vector.load %arg3[%c0_6, %c0_7] : memref<72x64xf32, #tpu.memory_space<vmem>>, vector<9x64xf32>
    %c9 = arith.constant 9 : index
    %c0_8 = arith.constant 0 : index
    %6 = vector.load %arg3[%c9, %c0_8] : memref<72x64xf32, #tpu.memory_space<vmem>>, vector<1x64xf32>
    %c10 = arith.constant 10 : index
    %c0_9 = arith.constant 0 : index
    %7 = vector.load %arg3[%c10, %c0_9] : memref<72x64xf32, #tpu.memory_space<vmem>>, vector<1x64xf32>
    %c11 = arith.constant 11 : index
    %c0_10 = arith.constant 0 : index
    %8 = vector.load %arg3[%c11, %c0_10] : memref<72x64xf32, #tpu.memory_space<vmem>>, vector<1x64xf32>
    %c0_11 = arith.constant 0 : index
    %c0_12 = arith.constant 0 : index
    %9 = vector.load %arg2[%c0_11, %c0_12] : memref<448x64xf32, #tpu.memory_space<vmem>>, vector<64x64xf32>
    %c64 = arith.constant 64 : index
    %c0_13 = arith.constant 0 : index
    %10 = vector.load %arg2[%c64, %c0_13] : memref<448x64xf32, #tpu.memory_space<vmem>>, vector<64x64xf32>
    %11 = vector.extract_strided_slice %4 {offsets = [0, 0], sizes = [32, 64], strides = [1, 1]} : vector<32x896xf32> to vector<32x64xf32>
    %12 = vector.extract_strided_slice %4 {offsets = [0, 128], sizes = [32, 64], strides = [1, 1]} : vector<32x896xf32> to vector<32x64xf32>
    %13 = vector.extract_strided_slice %4 {offsets = [0, 256], sizes = [32, 64], strides = [1, 1]} : vector<32x896xf32> to vector<32x64xf32>
    %cst_14 = arith.constant dense<0.000000e+00> : vector<288x64xf32>
    %14 = tpu.matmul %1, %0, %cst_14 {dimension_numbers = #tpu.dot_dimension_numbers<[1], [0], [0], [1], [0, 0, 1, 1], [], []>} : vector<288x32xf32>, vector<32x64xf32>, vector<288x64xf32> -> vector<288x64xf32>
    %15 = vector.extract_strided_slice %14 {offsets = [0, 0], sizes = [32, 64], strides = [1, 1]} : vector<288x64xf32> to vector<32x64xf32>
    %16 = vector.extract_strided_slice %5 {offsets = [0, 0], sizes = [1, 64], strides = [1, 1]} : vector<9x64xf32> to vector<1x64xf32>
    %17 = vector.broadcast %16 : vector<1x64xf32> to vector<32x64xf32>
    %18 = arith.mulf %15, %17 : vector<32x64xf32>
    %19 = vector.extract_strided_slice %14 {offsets = [32, 0], sizes = [32, 64], strides = [1, 1]} : vector<288x64xf32> to vector<32x64xf32>
    %20 = vector.extract_strided_slice %5 {offsets = [1, 0], sizes = [1, 64], strides = [1, 1]} : vector<9x64xf32> to vector<1x64xf32>
    %21 = vector.broadcast %20 : vector<1x64xf32> to vector<32x64xf32>
    %22 = arith.mulf %19, %21 : vector<32x64xf32>
    %23 = arith.addf %18, %22 : vector<32x64xf32>
    %24 = vector.extract_strided_slice %14 {offsets = [64, 0], sizes = [32, 64], strides = [1, 1]} : vector<288x64xf32> to vector<32x64xf32>
    %25 = vector.extract_strided_slice %5 {offsets = [2, 0], sizes = [1, 64], strides = [1, 1]} : vector<9x64xf32> to vector<1x64xf32>
    %26 = vector.broadcast %25 : vector<1x64xf32> to vector<32x64xf32>
    %27 = arith.mulf %24, %26 : vector<32x64xf32>
    %28 = arith.addf %23, %27 : vector<32x64xf32>
    %29 = vector.extract_strided_slice %14 {offsets = [96, 0], sizes = [32, 64], strides = [1, 1]} : vector<288x64xf32> to vector<32x64xf32>
    %30 = vector.extract_strided_slice %5 {offsets = [3, 0], sizes = [1, 64], strides = [1, 1]} : vector<9x64xf32> to vector<1x64xf32>
    %31 = vector.broadcast %30 : vector<1x64xf32> to vector<32x64xf32>
    %32 = arith.mulf %29, %31 : vector<32x64xf32>
    %33 = arith.addf %28, %32 : vector<32x64xf32>
    %34 = vector.extract_strided_slice %14 {offsets = [128, 0], sizes = [32, 64], strides = [1, 1]} : vector<288x64xf32> to vector<32x64xf32>
    %35 = vector.extract_strided_slice %5 {offsets = [4, 0], sizes = [1, 64], strides = [1, 1]} : vector<9x64xf32> to vector<1x64xf32>
    %36 = vector.broadcast %35 : vector<1x64xf32> to vector<32x64xf32>
    %37 = arith.mulf %34, %36 : vector<32x64xf32>
    %38 = arith.addf %33, %37 : vector<32x64xf32>
    %39 = vector.extract_strided_slice %14 {offsets = [160, 0], sizes = [32, 64], strides = [1, 1]} : vector<288x64xf32> to vector<32x64xf32>
    %40 = vector.extract_strided_slice %5 {offsets = [5, 0], sizes = [1, 64], strides = [1, 1]} : vector<9x64xf32> to vector<1x64xf32>
    %41 = vector.broadcast %40 : vector<1x64xf32> to vector<32x64xf32>
    %42 = arith.mulf %39, %41 : vector<32x64xf32>
    %43 = arith.addf %38, %42 : vector<32x64xf32>
    %44 = vector.extract_strided_slice %14 {offsets = [192, 0], sizes = [32, 64], strides = [1, 1]} : vector<288x64xf32> to vector<32x64xf32>
    %45 = vector.extract_strided_slice %5 {offsets = [6, 0], sizes = [1, 64], strides = [1, 1]} : vector<9x64xf32> to vector<1x64xf32>
    %46 = vector.broadcast %45 : vector<1x64xf32> to vector<32x64xf32>
    %47 = arith.mulf %44, %46 : vector<32x64xf32>
    %48 = arith.addf %43, %47 : vector<32x64xf32>
    %49 = vector.extract_strided_slice %14 {offsets = [224, 0], sizes = [32, 64], strides = [1, 1]} : vector<288x64xf32> to vector<32x64xf32>
    %50 = vector.extract_strided_slice %5 {offsets = [7, 0], sizes = [1, 64], strides = [1, 1]} : vector<9x64xf32> to vector<1x64xf32>
    %51 = vector.broadcast %50 : vector<1x64xf32> to vector<32x64xf32>
    %52 = arith.mulf %49, %51 : vector<32x64xf32>
    %53 = arith.addf %48, %52 : vector<32x64xf32>
    %54 = vector.extract_strided_slice %14 {offsets = [256, 0], sizes = [32, 64], strides = [1, 1]} : vector<288x64xf32> to vector<32x64xf32>
    %55 = vector.extract_strided_slice %5 {offsets = [8, 0], sizes = [1, 64], strides = [1, 1]} : vector<9x64xf32> to vector<1x64xf32>
    %56 = vector.broadcast %55 : vector<1x64xf32> to vector<32x64xf32>
    %57 = arith.mulf %54, %56 : vector<32x64xf32>
    %58 = arith.addf %53, %57 : vector<32x64xf32>
    %cst_15 = arith.constant 1.000000e+00 : f32
    %59 = vector.broadcast %cst_15 : f32 to vector<32x64xf32>
    %60 = arith.addf %59, %11 : vector<32x64xf32>
    %61 = arith.mulf %60, %60 : vector<32x64xf32>
    %62 = vector.broadcast %6 : vector<1x64xf32> to vector<32x64xf32>
    %63 = arith.mulf %61, %62 : vector<32x64xf32>
    %cst_16 = arith.constant 9.99999997E-7 : f32
    %64 = vector.broadcast %cst_16 : f32 to vector<32x64xf32>
    %65 = arith.addf %63, %64 : vector<32x64xf32>
    %66 = math.rsqrt %65 : vector<32x64xf32>
    %67 = arith.mulf %60, %66 : vector<32x64xf32>
    %68 = arith.mulf %58, %67 : vector<32x64xf32>
    %cst_17 = arith.constant 1.000000e+00 : f32
    %69 = vector.broadcast %cst_17 : f32 to vector<32x64xf32>
    %70 = arith.addf %69, %12 : vector<32x64xf32>
    %cst_18 = arith.constant dense<0.000000e+00> : vector<32x64xf32>
    %71 = tpu.matmul %68, %9, %cst_18 {dimension_numbers = #tpu.dot_dimension_numbers<[1], [1], [0], [0], [0, 0, 1, 0], [], []>} : vector<32x64xf32>, vector<64x64xf32>, vector<32x64xf32> -> vector<32x64xf32>
    %72 = arith.mulf %70, %70 : vector<32x64xf32>
    %73 = vector.broadcast %7 : vector<1x64xf32> to vector<32x64xf32>
    %74 = arith.mulf %72, %73 : vector<32x64xf32>
    %cst_19 = arith.constant 9.99999997E-7 : f32
    %75 = vector.broadcast %cst_19 : f32 to vector<32x64xf32>
    %76 = arith.addf %74, %75 : vector<32x64xf32>
    %77 = math.rsqrt %76 : vector<32x64xf32>
    %78 = arith.mulf %70, %77 : vector<32x64xf32>
    %79 = arith.mulf %71, %78 : vector<32x64xf32>
    %cst_20 = arith.constant 0.707106769 : f32
    %80 = vector.broadcast %cst_20 : f32 to vector<32x64xf32>
    %81 = arith.mulf %79, %80 : vector<32x64xf32>
    %82 = math.absf %81 : vector<32x64xf32>
    %cst_21 = arith.constant 0.327591091 : f32
    %83 = vector.broadcast %cst_21 : f32 to vector<32x64xf32>
    %84 = arith.mulf %83, %82 : vector<32x64xf32>
    %cst_22 = arith.constant 1.000000e+00 : f32
    %85 = vector.broadcast %cst_22 : f32 to vector<32x64xf32>
    %86 = arith.addf %85, %84 : vector<32x64xf32>
    %cst_23 = arith.constant 1.000000e+00 : f32
    %87 = vector.broadcast %cst_23 : f32 to vector<32x64xf32>
    %88 = arith.divf %87, %86 : vector<32x64xf32>
    %cst_24 = arith.constant 1.06140542 : f32
    %89 = vector.broadcast %cst_24 : f32 to vector<32x64xf32>
    %90 = arith.mulf %88, %89 : vector<32x64xf32>
    %cst_25 = arith.constant -1.45315206 : f32
    %91 = vector.broadcast %cst_25 : f32 to vector<32x64xf32>
    %92 = arith.addf %91, %90 : vector<32x64xf32>
    %93 = arith.mulf %88, %92 : vector<32x64xf32>
    %cst_26 = arith.constant 1.42141378 : f32
    %94 = vector.broadcast %cst_26 : f32 to vector<32x64xf32>
    %95 = arith.addf %94, %93 : vector<32x64xf32>
    %96 = arith.mulf %88, %95 : vector<32x64xf32>
    %cst_27 = arith.constant -0.284496725 : f32
    %97 = vector.broadcast %cst_27 : f32 to vector<32x64xf32>
    %98 = arith.addf %97, %96 : vector<32x64xf32>
    %99 = arith.mulf %88, %98 : vector<32x64xf32>
    %cst_28 = arith.constant 0.254829586 : f32
    %100 = vector.broadcast %cst_28 : f32 to vector<32x64xf32>
    %101 = arith.addf %100, %99 : vector<32x64xf32>
    %102 = arith.mulf %88, %101 : vector<32x64xf32>
    %cst_29 = arith.constant 0.000000e+00 : f32
    %103 = vector.broadcast %cst_29 : f32 to vector<32x64xf32>
    %104 = arith.subf %103, %82 : vector<32x64xf32>
    %105 = arith.mulf %104, %82 : vector<32x64xf32>
    %106 = math.exp %105 : vector<32x64xf32>
    %107 = arith.mulf %102, %106 : vector<32x64xf32>
    %cst_30 = arith.constant 1.000000e+00 : f32
    %108 = vector.broadcast %cst_30 : f32 to vector<32x64xf32>
    %109 = arith.subf %108, %107 : vector<32x64xf32>
    %cst_31 = arith.constant 0.000000e+00 : f32
    %110 = vector.broadcast %cst_31 : f32 to vector<32x64xf32>
    %111 = arith.cmpf oge, %81, %110 : vector<32x64xf32>
    %cst_32 = arith.constant 0.000000e+00 : f32
    %112 = vector.broadcast %cst_32 : f32 to vector<32x64xf32>
    %113 = arith.subf %112, %109 : vector<32x64xf32>
    %114 = arith.select %111, %109, %113 : vector<32x64xi1>, vector<32x64xf32>
    %cst_33 = arith.constant 5.000000e-01 : f32
    %115 = vector.broadcast %cst_33 : f32 to vector<32x64xf32>
    %116 = arith.mulf %115, %79 : vector<32x64xf32>
    %cst_34 = arith.constant 1.000000e+00 : f32
    %117 = vector.broadcast %cst_34 : f32 to vector<32x64xf32>
    %118 = arith.addf %117, %114 : vector<32x64xf32>
    %119 = arith.mulf %116, %118 : vector<32x64xf32>
    %cst_35 = arith.constant 1.000000e+00 : f32
    %120 = vector.broadcast %cst_35 : f32 to vector<32x64xf32>
    %121 = arith.addf %120, %13 : vector<32x64xf32>
    %cst_36 = arith.constant dense<0.000000e+00> : vector<32x64xf32>
    %122 = tpu.matmul %119, %10, %cst_36 {dimension_numbers = #tpu.dot_dimension_numbers<[1], [1], [0], [0], [0, 0, 1, 0], [], []>} : vector<32x64xf32>, vector<64x64xf32>, vector<32x64xf32> -> vector<32x64xf32>
    %123 = arith.mulf %121, %121 : vector<32x64xf32>
    %124 = vector.broadcast %8 : vector<1x64xf32> to vector<32x64xf32>
    %125 = arith.mulf %123, %124 : vector<32x64xf32>
    %cst_37 = arith.constant 9.99999997E-7 : f32
    %126 = vector.broadcast %cst_37 : f32 to vector<32x64xf32>
    %127 = arith.addf %125, %126 : vector<32x64xf32>
    %128 = math.rsqrt %127 : vector<32x64xf32>
    %129 = arith.mulf %121, %128 : vector<32x64xf32>
    %130 = arith.mulf %122, %129 : vector<32x64xf32>
    %c16 = arith.constant 16 : index
    %c0_38 = arith.constant 0 : index
    %131 = vector.load %arg3[%c16, %c0_38] : memref<72x64xf32, #tpu.memory_space<vmem>>, vector<9x64xf32>
    %c25 = arith.constant 25 : index
    %c0_39 = arith.constant 0 : index
    %132 = vector.load %arg3[%c25, %c0_39] : memref<72x64xf32, #tpu.memory_space<vmem>>, vector<1x64xf32>
    %c26 = arith.constant 26 : index
    %c0_40 = arith.constant 0 : index
    %133 = vector.load %arg3[%c26, %c0_40] : memref<72x64xf32, #tpu.memory_space<vmem>>, vector<1x64xf32>
    %c27 = arith.constant 27 : index
    %c0_41 = arith.constant 0 : index
    %134 = vector.load %arg3[%c27, %c0_41] : memref<72x64xf32, #tpu.memory_space<vmem>>, vector<1x64xf32>
    %c128 = arith.constant 128 : index
    %c0_42 = arith.constant 0 : index
    %135 = vector.load %arg2[%c128, %c0_42] : memref<448x64xf32, #tpu.memory_space<vmem>>, vector<64x64xf32>
    %c192 = arith.constant 192 : index
    %c0_43 = arith.constant 0 : index
    %136 = vector.load %arg2[%c192, %c0_43] : memref<448x64xf32, #tpu.memory_space<vmem>>, vector<64x64xf32>
    %137 = vector.extract_strided_slice %4 {offsets = [0, 384], sizes = [32, 64], strides = [1, 1]} : vector<32x896xf32> to vector<32x64xf32>
    %138 = vector.extract_strided_slice %4 {offsets = [0, 512], sizes = [32, 64], strides = [1, 1]} : vector<32x896xf32> to vector<32x64xf32>
    %139 = vector.extract_strided_slice %4 {offsets = [0, 640], sizes = [32, 64], strides = [1, 1]} : vector<32x896xf32> to vector<32x64xf32>
    %cst_44 = arith.constant dense<0.000000e+00> : vector<288x64xf32>
    %140 = tpu.matmul %1, %130, %cst_44 {dimension_numbers = #tpu.dot_dimension_numbers<[1], [0], [0], [1], [0, 0, 1, 1], [], []>} : vector<288x32xf32>, vector<32x64xf32>, vector<288x64xf32> -> vector<288x64xf32>
    %141 = vector.extract_strided_slice %140 {offsets = [0, 0], sizes = [32, 64], strides = [1, 1]} : vector<288x64xf32> to vector<32x64xf32>
    %142 = vector.extract_strided_slice %131 {offsets = [0, 0], sizes = [1, 64], strides = [1, 1]} : vector<9x64xf32> to vector<1x64xf32>
    %143 = vector.broadcast %142 : vector<1x64xf32> to vector<32x64xf32>
    %144 = arith.mulf %141, %143 : vector<32x64xf32>
    %145 = vector.extract_strided_slice %140 {offsets = [32, 0], sizes = [32, 64], strides = [1, 1]} : vector<288x64xf32> to vector<32x64xf32>
    %146 = vector.extract_strided_slice %131 {offsets = [1, 0], sizes = [1, 64], strides = [1, 1]} : vector<9x64xf32> to vector<1x64xf32>
    %147 = vector.broadcast %146 : vector<1x64xf32> to vector<32x64xf32>
    %148 = arith.mulf %145, %147 : vector<32x64xf32>
    %149 = arith.addf %144, %148 : vector<32x64xf32>
    %150 = vector.extract_strided_slice %140 {offsets = [64, 0], sizes = [32, 64], strides = [1, 1]} : vector<288x64xf32> to vector<32x64xf32>
    %151 = vector.extract_strided_slice %131 {offsets = [2, 0], sizes = [1, 64], strides = [1, 1]} : vector<9x64xf32> to vector<1x64xf32>
    %152 = vector.broadcast %151 : vector<1x64xf32> to vector<32x64xf32>
    %153 = arith.mulf %150, %152 : vector<32x64xf32>
    %154 = arith.addf %149, %153 : vector<32x64xf32>
    %155 = vector.extract_strided_slice %140 {offsets = [96, 0], sizes = [32, 64], strides = [1, 1]} : vector<288x64xf32> to vector<32x64xf32>
    %156 = vector.extract_strided_slice %131 {offsets = [3, 0], sizes = [1, 64], strides = [1, 1]} : vector<9x64xf32> to vector<1x64xf32>
    %157 = vector.broadcast %156 : vector<1x64xf32> to vector<32x64xf32>
    %158 = arith.mulf %155, %157 : vector<32x64xf32>
    %159 = arith.addf %154, %158 : vector<32x64xf32>
    %160 = vector.extract_strided_slice %140 {offsets = [128, 0], sizes = [32, 64], strides = [1, 1]} : vector<288x64xf32> to vector<32x64xf32>
    %161 = vector.extract_strided_slice %131 {offsets = [4, 0], sizes = [1, 64], strides = [1, 1]} : vector<9x64xf32> to vector<1x64xf32>
    %162 = vector.broadcast %161 : vector<1x64xf32> to vector<32x64xf32>
    %163 = arith.mulf %160, %162 : vector<32x64xf32>
    %164 = arith.addf %159, %163 : vector<32x64xf32>
    %165 = vector.extract_strided_slice %140 {offsets = [160, 0], sizes = [32, 64], strides = [1, 1]} : vector<288x64xf32> to vector<32x64xf32>
    %166 = vector.extract_strided_slice %131 {offsets = [5, 0], sizes = [1, 64], strides = [1, 1]} : vector<9x64xf32> to vector<1x64xf32>
    %167 = vector.broadcast %166 : vector<1x64xf32> to vector<32x64xf32>
    %168 = arith.mulf %165, %167 : vector<32x64xf32>
    %169 = arith.addf %164, %168 : vector<32x64xf32>
    %170 = vector.extract_strided_slice %140 {offsets = [192, 0], sizes = [32, 64], strides = [1, 1]} : vector<288x64xf32> to vector<32x64xf32>
    %171 = vector.extract_strided_slice %131 {offsets = [6, 0], sizes = [1, 64], strides = [1, 1]} : vector<9x64xf32> to vector<1x64xf32>
    %172 = vector.broadcast %171 : vector<1x64xf32> to vector<32x64xf32>
    %173 = arith.mulf %170, %172 : vector<32x64xf32>
    %174 = arith.addf %169, %173 : vector<32x64xf32>
    %175 = vector.extract_strided_slice %140 {offsets = [224, 0], sizes = [32, 64], strides = [1, 1]} : vector<288x64xf32> to vector<32x64xf32>
    %176 = vector.extract_strided_slice %131 {offsets = [7, 0], sizes = [1, 64], strides = [1, 1]} : vector<9x64xf32> to vector<1x64xf32>
    %177 = vector.broadcast %176 : vector<1x64xf32> to vector<32x64xf32>
    %178 = arith.mulf %175, %177 : vector<32x64xf32>
    %179 = arith.addf %174, %178 : vector<32x64xf32>
    %180 = vector.extract_strided_slice %140 {offsets = [256, 0], sizes = [32, 64], strides = [1, 1]} : vector<288x64xf32> to vector<32x64xf32>
    %181 = vector.extract_strided_slice %131 {offsets = [8, 0], sizes = [1, 64], strides = [1, 1]} : vector<9x64xf32> to vector<1x64xf32>
    %182 = vector.broadcast %181 : vector<1x64xf32> to vector<32x64xf32>
    %183 = arith.mulf %180, %182 : vector<32x64xf32>
    %184 = arith.addf %179, %183 : vector<32x64xf32>
    %cst_45 = arith.constant 1.000000e+00 : f32
    %185 = vector.broadcast %cst_45 : f32 to vector<32x64xf32>
    %186 = arith.addf %185, %137 : vector<32x64xf32>
    %187 = arith.mulf %186, %186 : vector<32x64xf32>
    %188 = vector.broadcast %132 : vector<1x64xf32> to vector<32x64xf32>
    %189 = arith.mulf %187, %188 : vector<32x64xf32>
    %cst_46 = arith.constant 9.99999997E-7 : f32
    %190 = vector.broadcast %cst_46 : f32 to vector<32x64xf32>
    %191 = arith.addf %189, %190 : vector<32x64xf32>
    %192 = math.rsqrt %191 : vector<32x64xf32>
    %193 = arith.mulf %186, %192 : vector<32x64xf32>
    %194 = arith.mulf %184, %193 : vector<32x64xf32>
    %cst_47 = arith.constant 1.000000e+00 : f32
    %195 = vector.broadcast %cst_47 : f32 to vector<32x64xf32>
    %196 = arith.addf %195, %138 : vector<32x64xf32>
    %cst_48 = arith.constant dense<0.000000e+00> : vector<32x64xf32>
    %197 = tpu.matmul %194, %135, %cst_48 {dimension_numbers = #tpu.dot_dimension_numbers<[1], [1], [0], [0], [0, 0, 1, 0], [], []>} : vector<32x64xf32>, vector<64x64xf32>, vector<32x64xf32> -> vector<32x64xf32>
    %198 = arith.mulf %196, %196 : vector<32x64xf32>
    %199 = vector.broadcast %133 : vector<1x64xf32> to vector<32x64xf32>
    %200 = arith.mulf %198, %199 : vector<32x64xf32>
    %cst_49 = arith.constant 9.99999997E-7 : f32
    %201 = vector.broadcast %cst_49 : f32 to vector<32x64xf32>
    %202 = arith.addf %200, %201 : vector<32x64xf32>
    %203 = math.rsqrt %202 : vector<32x64xf32>
    %204 = arith.mulf %196, %203 : vector<32x64xf32>
    %205 = arith.mulf %197, %204 : vector<32x64xf32>
    %cst_50 = arith.constant 0.707106769 : f32
    %206 = vector.broadcast %cst_50 : f32 to vector<32x64xf32>
    %207 = arith.mulf %205, %206 : vector<32x64xf32>
    %208 = math.absf %207 : vector<32x64xf32>
    %cst_51 = arith.constant 0.327591091 : f32
    %209 = vector.broadcast %cst_51 : f32 to vector<32x64xf32>
    %210 = arith.mulf %209, %208 : vector<32x64xf32>
    %cst_52 = arith.constant 1.000000e+00 : f32
    %211 = vector.broadcast %cst_52 : f32 to vector<32x64xf32>
    %212 = arith.addf %211, %210 : vector<32x64xf32>
    %cst_53 = arith.constant 1.000000e+00 : f32
    %213 = vector.broadcast %cst_53 : f32 to vector<32x64xf32>
    %214 = arith.divf %213, %212 : vector<32x64xf32>
    %cst_54 = arith.constant 1.06140542 : f32
    %215 = vector.broadcast %cst_54 : f32 to vector<32x64xf32>
    %216 = arith.mulf %214, %215 : vector<32x64xf32>
    %cst_55 = arith.constant -1.45315206 : f32
    %217 = vector.broadcast %cst_55 : f32 to vector<32x64xf32>
    %218 = arith.addf %217, %216 : vector<32x64xf32>
    %219 = arith.mulf %214, %218 : vector<32x64xf32>
    %cst_56 = arith.constant 1.42141378 : f32
    %220 = vector.broadcast %cst_56 : f32 to vector<32x64xf32>
    %221 = arith.addf %220, %219 : vector<32x64xf32>
    %222 = arith.mulf %214, %221 : vector<32x64xf32>
    %cst_57 = arith.constant -0.284496725 : f32
    %223 = vector.broadcast %cst_57 : f32 to vector<32x64xf32>
    %224 = arith.addf %223, %222 : vector<32x64xf32>
    %225 = arith.mulf %214, %224 : vector<32x64xf32>
    %cst_58 = arith.constant 0.254829586 : f32
    %226 = vector.broadcast %cst_58 : f32 to vector<32x64xf32>
    %227 = arith.addf %226, %225 : vector<32x64xf32>
    %228 = arith.mulf %214, %227 : vector<32x64xf32>
    %cst_59 = arith.constant 0.000000e+00 : f32
    %229 = vector.broadcast %cst_59 : f32 to vector<32x64xf32>
    %230 = arith.subf %229, %208 : vector<32x64xf32>
    %231 = arith.mulf %230, %208 : vector<32x64xf32>
    %232 = math.exp %231 : vector<32x64xf32>
    %233 = arith.mulf %228, %232 : vector<32x64xf32>
    %cst_60 = arith.constant 1.000000e+00 : f32
    %234 = vector.broadcast %cst_60 : f32 to vector<32x64xf32>
    %235 = arith.subf %234, %233 : vector<32x64xf32>
    %cst_61 = arith.constant 0.000000e+00 : f32
    %236 = vector.broadcast %cst_61 : f32 to vector<32x64xf32>
    %237 = arith.cmpf oge, %207, %236 : vector<32x64xf32>
    %cst_62 = arith.constant 0.000000e+00 : f32
    %238 = vector.broadcast %cst_62 : f32 to vector<32x64xf32>
    %239 = arith.subf %238, %235 : vector<32x64xf32>
    %240 = arith.select %237, %235, %239 : vector<32x64xi1>, vector<32x64xf32>
    %cst_63 = arith.constant 5.000000e-01 : f32
    %241 = vector.broadcast %cst_63 : f32 to vector<32x64xf32>
    %242 = arith.mulf %241, %205 : vector<32x64xf32>
    %cst_64 = arith.constant 1.000000e+00 : f32
    %243 = vector.broadcast %cst_64 : f32 to vector<32x64xf32>
    %244 = arith.addf %243, %240 : vector<32x64xf32>
    %245 = arith.mulf %242, %244 : vector<32x64xf32>
    %cst_65 = arith.constant 1.000000e+00 : f32
    %246 = vector.broadcast %cst_65 : f32 to vector<32x64xf32>
    %247 = arith.addf %246, %139 : vector<32x64xf32>
    %cst_66 = arith.constant dense<0.000000e+00> : vector<32x64xf32>
    %248 = tpu.matmul %245, %136, %cst_66 {dimension_numbers = #tpu.dot_dimension_numbers<[1], [1], [0], [0], [0, 0, 1, 0], [], []>} : vector<32x64xf32>, vector<64x64xf32>, vector<32x64xf32> -> vector<32x64xf32>
    %249 = arith.mulf %247, %247 : vector<32x64xf32>
    %250 = vector.broadcast %134 : vector<1x64xf32> to vector<32x64xf32>
    %251 = arith.mulf %249, %250 : vector<32x64xf32>
    %cst_67 = arith.constant 9.99999997E-7 : f32
    %252 = vector.broadcast %cst_67 : f32 to vector<32x64xf32>
    %253 = arith.addf %251, %252 : vector<32x64xf32>
    %254 = math.rsqrt %253 : vector<32x64xf32>
    %255 = arith.mulf %247, %254 : vector<32x64xf32>
    %256 = arith.mulf %248, %255 : vector<32x64xf32>
    %c256 = arith.constant 256 : index
    %c0_68 = arith.constant 0 : index
    %257 = vector.load %arg2[%c256, %c0_68] : memref<448x64xf32, #tpu.memory_space<vmem>>, vector<64x64xf32>
    %c320 = arith.constant 320 : index
    %c0_69 = arith.constant 0 : index
    %258 = vector.load %arg2[%c320, %c0_69] : memref<448x64xf32, #tpu.memory_space<vmem>>, vector<128x64xf32>
    %c32 = arith.constant 32 : index
    %c0_70 = arith.constant 0 : index
    %259 = vector.load %arg3[%c32, %c0_70] : memref<72x64xf32, #tpu.memory_space<vmem>>, vector<1x64xf32>
    %cst_71 = arith.constant dense<0.000000e+00> : vector<32x64xf32>
    %260 = tpu.matmul %256, %257, %cst_71 {dimension_numbers = #tpu.dot_dimension_numbers<[1], [1], [0], [0], [0, 0, 1, 0], [], []>} : vector<32x64xf32>, vector<64x64xf32>, vector<32x64xf32> -> vector<32x64xf32>
    %261 = vector.broadcast %259 : vector<1x64xf32> to vector<32x64xf32>
    %262 = arith.addf %260, %261 : vector<32x64xf32>
    %263 = vector.extract_strided_slice %4 {offsets = [0, 768], sizes = [32, 128], strides = [1, 1]} : vector<32x896xf32> to vector<32x128xf32>
    %cst_72 = arith.constant dense<0.000000e+00> : vector<32x128xf32>
    %264 = tpu.matmul %262, %258, %cst_72 {dimension_numbers = #tpu.dot_dimension_numbers<[1], [1], [0], [0], [0, 0, 1, 0], [], []>} : vector<32x64xf32>, vector<128x64xf32>, vector<32x128xf32> -> vector<32x128xf32>
    %cst_73 = arith.constant 1.000000e+00 : f32
    %265 = vector.broadcast %cst_73 : f32 to vector<32x128xf32>
    %266 = arith.addf %265, %263 : vector<32x128xf32>
    %267 = arith.mulf %264, %266 : vector<32x128xf32>
    %268 = math.tanh %267 : vector<32x128xf32>
    %c0_74 = arith.constant 0 : index
    %c0_75 = arith.constant 0 : index
    %269 = vector.load %arg5[%c0_74, %c0_75] : memref<32x128xf32, #tpu.memory_space<vmem>>, vector<32x128xf32>
    tpu.vector_store %arg5[%c0_74, %c0_75], %268 {strides = array<i32>} : memref<32x128xf32, #tpu.memory_space<vmem>>, vector<32x128xf32>,
    return
  }
}

</mosaic_0001>

<bundles_post_ra>
// kernel: fwd.1
= control target key start
LH: loop header
LB: loop body
LE: loop exit
PB: predicated region body
PF: predicated region fallthrough
CT: control target
= control target key end

     0   :  { %vm176_vm0 = vcmask 269312   ;;  %vm898_vm2 = vcmask 261120   ;;  %vm1392_vm3 = vcmask 523264   ;;  %s5860_s1 = inlined_call_operand.vmem [shape: f32[896,33], index: 1, kind: input, shape index: {}]   ;;  %s5861_s0 = inlined_call_operand.vmem [shape: f32[32,33], index: 0, kind: input, shape index: {}]   ;;  %s5862_s3 = inlined_call_operand.vmem [shape: f32[72,64], index: 3, kind: input, shape index: {}]   ;;  %s5863_s4 = inlined_call_operand.vmem [shape: f32[288,32], index: 4, kind: input, shape index: {}]   ;;  %s5864_s2 = inlined_call_operand.vmem [shape: f32[448,64], index: 2, kind: input, shape index: {}]   ;;  %s5865_s5 = inlined_call_operand.vmem [shape: f32[32,128], index: 5, kind: output, shape index: {}]  }
   0x1   :  { %v80_v0 = vld [vmem:[%s5860_s1 + $0x80] sm:$0xff]  ;;  %v81_v1 = vld [vmem:[%s5860_s1 + $0x88] sm:$0xff]  ;;  %vm4344_vm1 = vmpackc.low %vm176_vm0, %vm176_vm0 }
   0x2   :  { %v3833_v3 = vpack.c.bf16 %v81_v1, %v80_v0  ;;  %v64_v4 = vld [vmem:[%s5860_s1] sm:$0xff]  ;;  %v65_v5 = vld [vmem:[%s5860_s1 + $0x8] sm:$0xff]  ;;  %v82_v9 = vld [vmem:[%s5860_s1 + $0x90] sm:$0xff] }
   0x3   :  { %v112_v6 = vld [vmem:[%s5860_s1 + $0x180] sm:$0xff]  ;;  %v3836_v7 = vpack.c.bf16 %v65_v5, %v64_v4  ;;  %v113_v8 = vld [vmem:[%s5860_s1 + $0x188] sm:$0xff]  ;;  %v83_v10 = vld [vmem:[%s5860_s1 + $0x98] sm:$0xff] }
   0x4   :  { %3835 = vmatprep.subr.msk.bf16.mxu0 %vm4344_vm1, %v3833_v3  ;;  %v3881_v11 = vpack.c.bf16 %v113_v8, %v112_v6  ;;  %v3839_v12 = vpack.c.bf16 %v83_v10, %v82_v9  ;;  %v96_v13 = vld [vmem:[%s5860_s1 + $0x100] sm:$0xff]  ;;  %v97_v14 = vld [vmem:[%s5860_s1 + $0x108] sm:$0xff]  ;;  %v114_v16 = vld [vmem:[%s5860_s1 + $0x190] sm:$0xff] }
   0x5   :  { %3838 = vmatpush3.bf16.xpose.msk.msra.mxu0 %vm4344_vm1, %v3836_v7  ;;  %v3884_v15 = vpack.c.bf16 %v97_v14, %v96_v13  ;;  %v115_v17 = vld [vmem:[%s5860_s1 + $0x198] sm:$0xff]  ;;  %v66_v18 = vld [vmem:[%s5860_s1 + $0x10] sm:$0xff]  ;;  %v84_v21 = vld [vmem:[%s5860_s1 + $0xa0] sm:$0xff] }
   0x6   :  { %3883 = vmatprep.subr.msk.bf16.mxu1 %vm4344_vm1, %v3881_v11  ;;  %3841 = vmatprep.subr.msk.bf16.mxu0 %vm4344_vm1, %v3839_v12  ;;  %v67_v19 = vld [vmem:[%s5860_s1 + $0x18] sm:$0xff]  ;;  %v3887_v20 = vpack.c.bf16 %v115_v17, %v114_v16  ;;  %v85_v22 = vld [vmem:[%s5860_s1 + $0xa8] sm:$0xff]  ;;  %v98_v23 = vld [vmem:[%s5860_s1 + $0x110] sm:$0xff] }
   0x7   :  { %3886 = vmatpush3.bf16.xpose.msk.msra.mxu1 %vm4344_vm1, %v3884_v15  ;;  %v99_v24 = vld [vmem:[%s5860_s1 + $0x118] sm:$0xff]  ;;  %v3842_v25 = vpack.c.bf16 %v67_v19, %v66_v18  ;;  %v116_v26 = vld [vmem:[%s5860_s1 + $0x1a0] sm:$0xff]  ;;  %v117_v27 = vld [vmem:[%s5860_s1 + $0x1a8] sm:$0xff]  ;;  %v3845_v28 = vpack.c.bf16 %v85_v22, %v84_v21 }
   0x8   :  { %3889 = vmatprep.subr.msk.bf16.mxu1 %vm4344_vm1, %v3887_v20  ;;  %v3890_v29 = vpack.c.bf16 %v99_v24, %v98_v23  ;;  %v3893_v30 = vpack.c.bf16 %v117_v27, %v116_v26  ;;  %v68_v31 = vld [vmem:[%s5860_s1 + $0x20] sm:$0xff]  ;;  %v69_v32 = vld [vmem:[%s5860_s1 + $0x28] sm:$0xff]  ;;  %v86_v33 = vld [vmem:[%s5860_s1 + $0xb0] sm:$0xff] }
   0x9   :  { %v87_v34 = vld [vmem:[%s5860_s1 + $0xb8] sm:$0xff]  ;;  %v100_v35 = vld [vmem:[%s5860_s1 + $0x120] sm:$0xff]  ;;  %v101_v36 = vld [vmem:[%s5860_s1 + $0x128] sm:$0xff]  ;;  %v3848_v37 = vpack.c.bf16 %v69_v32, %v68_v31 }
   0xa   :  { %v118_v38 = vld [vmem:[%s5860_s1 + $0x1b0] sm:$0xff]  ;;  %v119_v39 = vld [vmem:[%s5860_s1 + $0x1b8] sm:$0xff]  ;;  %v3851_v40 = vpack.c.bf16 %v87_v34, %v86_v33  ;;  %v3896_v41 = vpack.c.bf16 %v101_v36, %v100_v35  ;;  %v4451_v43 = vld [vmem:[%s5861_s0] sm:$0xff] }
   0xb   :  { %v3899_v42 = vpack.c.bf16 %v119_v39, %v118_v38  ;;  %v70_v44 = vld [vmem:[%s5860_s1 + $0x30] sm:$0xff]  ;;  %v71_v45 = vld [vmem:[%s5860_s1 + $0x38] sm:$0xff]  ;;  %3255 = vmatprep.mubr.msk.f32.mxu0 %vm176_vm0, %v4451_v43  ;;  %v88_v46 = vld [vmem:[%s5860_s1 + $0xc0] sm:$0xff]  ;;  %3295 = vmatprep.mubr.msk.f32.mxu1 %vm176_vm0, %v4451_v43 }
   0xc   :  { %v89_v47 = vld [vmem:[%s5860_s1 + $0xc8] sm:$0xff]  ;;  %v102_v48 = vld [vmem:[%s5860_s1 + $0x130] sm:$0xff]  ;;  %v103_v49 = vld [vmem:[%s5860_s1 + $0x138] sm:$0xff]  ;;  %v3854_v50 = vpack.c.bf16 %v71_v45, %v70_v44 }
   0xd   :  { %3844 = vmatpush3.bf16.xpose.msk.msra.mxu0 %vm4344_vm1, %v3842_v25  ;;  %v120_v51 = vld [vmem:[%s5860_s1 + $0x1c0] sm:$0xff]  ;;  %v121_v52 = vld [vmem:[%s5860_s1 + $0x1c8] sm:$0xff]  ;;  %v3857_v53 = vpack.c.bf16 %v89_v47, %v88_v46  ;;  %v3902_v54 = vpack.c.bf16 %v103_v49, %v102_v48  ;;  %v90_v58 = vld [vmem:[%s5860_s1 + $0xd0] sm:$0xff] }
   0xe   :  { %3847 = vmatprep.subr.msk.bf16.mxu0 %vm4344_vm1, %v3845_v28  ;;  %v3905_v55 = vpack.c.bf16 %v121_v52, %v120_v51  ;;  %v72_v56 = vld [vmem:[%s5860_s1 + $0x40] sm:$0xff]  ;;  %v73_v57 = vld [vmem:[%s5860_s1 + $0x48] sm:$0xff]  ;;  %v91_v59 = vld [vmem:[%s5860_s1 + $0xd8] sm:$0xff] }
   0xf   :  { %3892 = vmatpush3.bf16.xpose.msk.msra.mxu1 %vm4344_vm1, %v3890_v29  ;;  %v104_v60 = vld [vmem:[%s5860_s1 + $0x140] sm:$0xff]  ;;  %v105_v61 = vld [vmem:[%s5860_s1 + $0x148] sm:$0xff]  ;;  %v3860_v62 = vpack.c.bf16 %v73_v57, %v72_v56  ;;  %v122_v63 = vld [vmem:[%s5860_s1 + $0x1d0] sm:$0xff]  ;;  %v3863_v1 = vpack.c.bf16 %v91_v59, %v90_v58 }
  0x10   :  { %3895 = vmatprep.subr.msk.bf16.mxu1 %vm4344_vm1, %v3893_v30  ;;  %v123_v0 = vld [vmem:[%s5860_s1 + $0x1d8] sm:$0xff]  ;;  %v3908_v3 = vpack.c.bf16 %v105_v61, %v104_v60  ;;  %v74_v5 = vld [vmem:[%s5860_s1 + $0x50] sm:$0xff]  ;;  %v92_v7 = vld [vmem:[%s5860_s1 + $0xe0] sm:$0xff] }
  0x11   :  { %v3911_v4 = vpack.c.bf16 %v123_v0, %v122_v63  ;;  %v75_v6 = vld [vmem:[%s5860_s1 + $0x58] sm:$0xff]  ;;  %v93_v8 = vld [vmem:[%s5860_s1 + $0xe8] sm:$0xff]  ;;  %v106_v9 = vld [vmem:[%s5860_s1 + $0x150] sm:$0xff] }
  0x12   :  { %v107_v10 = vld [vmem:[%s5860_s1 + $0x158] sm:$0xff]  ;;  %v3866_v11 = vpack.c.bf16 %v75_v6, %v74_v5  ;;  %v124_v12 = vld [vmem:[%s5860_s1 + $0x1e0] sm:$0xff]  ;;  %v125_v13 = vld [vmem:[%s5860_s1 + $0x1e8] sm:$0xff]  ;;  %v3869_v14 = vpack.c.bf16 %v93_v8, %v92_v7 }
  0x13   :  { %v3914_v15 = vpack.c.bf16 %v107_v10, %v106_v9  ;;  %v3917_v16 = vpack.c.bf16 %v125_v13, %v124_v12  ;;  %v76_v17 = vld [vmem:[%s5860_s1 + $0x60] sm:$0xff]  ;;  %v77_v18 = vld [vmem:[%s5860_s1 + $0x68] sm:$0xff]  ;;  %v94_v19 = vld [vmem:[%s5860_s1 + $0xf0] sm:$0xff] }
  0x14   :  { %v95_v20 = vld [vmem:[%s5860_s1 + $0xf8] sm:$0xff]  ;;  %v108_v21 = vld [vmem:[%s5860_s1 + $0x160] sm:$0xff]  ;;  %v109_v22 = vld [vmem:[%s5860_s1 + $0x168] sm:$0xff]  ;;  %v3872_v23 = vpack.c.bf16 %v77_v18, %v76_v17 }
  0x15   :  { %3850 = vmatpush3.bf16.xpose.msk.msra.mxu0 %vm4344_vm1, %v3848_v37  ;;  %v126_v24 = vld [vmem:[%s5860_s1 + $0x1f0] sm:$0xff]  ;;  %v127_v25 = vld [vmem:[%s5860_s1 + $0x1f8] sm:$0xff]  ;;  %v3875_v26 = vpack.c.bf16 %v95_v20, %v94_v19  ;;  %v3920_v27 = vpack.c.bf16 %v109_v22, %v108_v21  ;;  %v144_v31 = vld [vmem:[%s5860_s1 + $0x280] sm:$0xff] }
  0x16   :  { %3853 = vmatprep.subr.msk.bf16.mxu0 %vm4344_vm1, %v3851_v40  ;;  %v3923_v28 = vpack.c.bf16 %v127_v25, %v126_v24  ;;  %v78_v29 = vld [vmem:[%s5860_s1 + $0x70] sm:$0xff]  ;;  %v79_v30 = vld [vmem:[%s5860_s1 + $0x78] sm:$0xff]  ;;  %v145_v32 = vld [vmem:[%s5860_s1 + $0x288] sm:$0xff] }
  0x17   :  { %3898 = vmatpush3.bf16.xpose.msk.msra.mxu1 %vm4344_vm1, %v3896_v41  ;;  %v110_v33 = vld [vmem:[%s5860_s1 + $0x170] sm:$0xff]  ;;  %v111_v34 = vld [vmem:[%s5860_s1 + $0x178] sm:$0xff]  ;;  %v3878_v35 = vpack.c.bf16 %v79_v30, %v78_v29  ;;  %v160_v36 = vld [vmem:[%s5860_s1 + $0x300] sm:$0xff]  ;;  %v3929_v38 = vpack.c.bf16 %v145_v32, %v144_v31 }
  0x18   :  { %3901 = vmatprep.subr.msk.bf16.mxu1 %vm4344_vm1, %v3899_v42  ;;  %v161_v37 = vld [vmem:[%s5860_s1 + $0x308] sm:$0xff]  ;;  %v3926_v39 = vpack.c.bf16 %v111_v34, %v110_v33  ;;  %v128_v41 = vld [vmem:[%s5860_s1 + $0x200] sm:$0xff]  ;;  %v146_v44 = vld [vmem:[%s5860_s1 + $0x290] sm:$0xff] }
  0x19   :  { %v3977_v40 = vpack.c.bf16 %v161_v37, %v160_v36  ;;  %v129_v42 = vld [vmem:[%s5860_s1 + $0x208] sm:$0xff]  ;;  %v147_v45 = vld [vmem:[%s5860_s1 + $0x298] sm:$0xff]  ;;  %v162_v47 = vld [vmem:[%s5860_s1 + $0x310] sm:$0xff] }
  0x1a   :  { %v3932_v46 = vpack.c.bf16 %v129_v42, %v128_v41  ;;  %v163_v48 = vld [vmem:[%s5860_s1 + $0x318] sm:$0xff]  ;;  %v3935_v49 = vpack.c.bf16 %v147_v45, %v146_v44  ;;  %v130_v52 = vld [vmem:[%s5860_s1 + $0x210] sm:$0xff]  ;;  %v149_v56 = vld [vmem:[%s5860_s1 + $0x2a8] sm:$0xff] }
  0x1b   :  { %v3983_v51 = vpack.c.bf16 %v163_v48, %v162_v47  ;;  %v164_v58 = vld [vmem:[%s5860_s1 + $0x320] sm:$0xff]  ;;  %v165_v59 = vld [vmem:[%s5860_s1 + $0x328] sm:$0xff]  ;;  %v4692_v61 = vld [vmem:[%s5861_s0 + $0x18] sm:$0xff] }
  0x1c   :  { %v132_v63 = vld [vmem:[%s5860_s1 + $0x220] sm:$0xff]  ;;  %v133_v0 = vld [vmem:[%s5860_s1 + $0x228] sm:$0xff]  ;;  %v166_v5 = vld [vmem:[%s5860_s1 + $0x330] sm:$0xff] }
  0x1d   :  { %3856 = vmatpush3.bf16.xpose.msk.msra.mxu0 %vm4344_vm1, %v3854_v50  ;;  %v4644_v50 = vld [vmem:[%s5861_s0 + $0x8] sm:$0xff]  ;;  %v167_v6 = vld [vmem:[%s5860_s1 + $0x338] sm:$0xff]  ;;  %v134_v9 = vld [vmem:[%s5860_s1 + $0x230] sm:$0xff] }
  0x1e   :  { %3859 = vmatprep.subr.msk.bf16.mxu0 %vm4344_vm1, %v3857_v53  ;;  %v131_v53 = vld [vmem:[%s5860_s1 + $0x218] sm:$0xff]  ;;  %v3995_v8 = vpack.c.bf16 %v167_v6, %v166_v5  ;;  %v153_v12 = vld [vmem:[%s5860_s1 + $0x2c8] sm:$0xff]  ;;  %v136_v18 = vld [vmem:[%s5860_s1 + $0x240] sm:$0xff] }
  0x1f   :  { %3904 = vmatpush3.bf16.xpose.msk.msra.mxu1 %vm4344_vm1, %v3902_v54  ;;  %v4665_v54 = vld [vmem:[%s5861_s0 + $0x10] sm:$0xff]  ;;  %v3938_v57 = vpack.c.bf16 %v131_v53, %v130_v52  ;;  %v135_v10 = vld [vmem:[%s5860_s1 + $0x238] sm:$0xff]  ;;  %v137_v19 = vld [vmem:[%s5860_s1 + $0x248] sm:$0xff] }
  0x20   :  { %3907 = vmatprep.subr.msk.bf16.mxu1 %vm4344_vm1, %v3905_v55  ;;  %v148_v55 = vld [vmem:[%s5860_s1 + $0x2a0] sm:$0xff]  ;;  %v3950_v13 = vpack.c.bf16 %v135_v10, %v134_v9  ;;  %v154_v20 = vld [vmem:[%s5860_s1 + $0x2d0] sm:$0xff]  ;;  %v155_v21 = vld [vmem:[%s5860_s1 + $0x2d8] sm:$0xff]  ;;  %v3956_v22 = vpack.c.bf16 %v137_v19, %v136_v18 }
  0x21   :  { %v3941_v60 = vpack.c.bf16 %v149_v56, %v148_v55  ;;  %v171_v24 = vld [vmem:[%s5860_s1 + $0x358] sm:$0xff]  ;;  %v3959_v25 = vpack.c.bf16 %v155_v21, %v154_v20  ;;  %v156_v29 = vld [vmem:[%s5860_s1 + $0x2e0] sm:$0xff]  ;;  %v157_v30 = vld [vmem:[%s5860_s1 + $0x2e8] sm:$0xff] }
  0x22   :  { %v172_v32 = vld [vmem:[%s5860_s1 + $0x360] sm:$0xff]  ;;  %v173_v33 = vld [vmem:[%s5860_s1 + $0x368] sm:$0xff]  ;;  %v3965_v34 = vpack.c.bf16 %v157_v30, %v156_v29  ;;  %v174_v41 = vld [vmem:[%s5860_s1 + $0x370] sm:$0xff] }
  0x23   :  { %v140_v36 = vld [vmem:[%s5860_s1 + $0x260] sm:$0xff]  ;;  %v141_v37 = vld [vmem:[%s5860_s1 + $0x268] sm:$0xff]  ;;  %v175_v42 = vld [vmem:[%s5860_s1 + $0x378] sm:$0xff] }
  0x24   :  { %v4019_v45 = vpack.c.bf16 %v175_v42, %v174_v41  ;;  %v143_v47 = vld [vmem:[%s5860_s1 + $0x278] sm:$0xff]  ;;  %v20_v48 = vld [vmem:[%s5862_s3 + $0x28] sm:$0xff]  ;;  %v23_v55 = vld [vmem:[%s5862_s3 + $0x40] sm:$0xff] }
  0x25   :  { %3862 = vmatpush3.bf16.xpose.msk.msra.mxu0 %vm4344_vm1, %v3860_v62  ;;  %v3989_v62 = vpack.c.bf16 %v165_v59, %v164_v58  ;;  %v22_v53 = vld [vmem:[%s5862_s3 + $0x38] sm:$0xff]  ;;  %v44_v2 = vld [vmem:[%s5863_s4 + $0xa0] sm:$0xff]  ;;  %v4922_v59 = vld [vmem:[%s5863_s4 + $0x8] sm:$0xff] }
  0x26   :  { %3865 = vmatprep.subr.msk.bf16.mxu0 %vm4344_vm1, %v3863_v1  ;;  %v150_v1 = vld [vmem:[%s5860_s1 + $0x2b0] sm:$0xff]  ;;  %v4029_v56 = vpack.c.bf16 %v23_v55, %v22_v53  ;;  %v48_v58 = vld [vmem:[%s5863_s4 + $0xc0] sm:$0xff]  ;;  %v4990_v6 = vld [vmem:[%s5863_s4 + $0xe8] sm:$0xff] }
  0x27   :  { %3910 = vmatpush3.bf16.xpose.msk.msra.mxu1 %vm4344_vm1, %v3908_v3  ;;  %v151_v3 = vld [vmem:[%s5860_s1 + $0x2b8] sm:$0xff]  ;;  %v4981_v5 = vld [vmem:[%s5863_s4 + $0x30] sm:$0xff]  ;;  %5903 = vst [vmem:[#allocation7_spill] sm:$0xff] %v4990_v6  ;;  %v5009_v9 = vld [vmem:[%s5863_s4 + $0x40] sm:$0xff] }
  0x28   :  { %3913 = vmatprep.subr.msk.bf16.mxu1 %vm4344_vm1, %v3911_v4  ;;  %v3944_v4 = vpack.c.bf16 %v133_v0, %v132_v63  ;;  %v3947_v7 = vpack.c.bf16 %v151_v3, %v150_v1  ;;  %v4948_v63 = vld [vmem:[%s5863_s4 + $0x18] sm:$0xff]  ;;  %v4953_v0 = vld [vmem:[%s5863_s4 + $0x20] sm:$0xff]  ;;  %5902 = vst [vmem:[#allocation6_spill] sm:$0xff] %v4981_v5  ;;  %5906 = vst [vmem:[#allocation10_spill] sm:$0xff] %v5009_v9 }
  0x29   :  { %v4962_v1 = vld [vmem:[%s5863_s4 + $0xd8] sm:$0xff]  ;;  %v4969_v3 = vld [vmem:[%s5863_s4 + $0xe0] sm:$0xff]  ;;  %v5083_v19 = vld [vmem:[%s5863_s4 + $0x68] sm:$0xff] }
  0x2a   :  { %5900 = vst [vmem:[#allocation4_spill] sm:$0xff] %v4962_v1  ;;  %5901 = vst [vmem:[#allocation5_spill] sm:$0xff] %v4969_v3  ;;  %v5018_v10 = vld [vmem:[%s5863_s4 + $0xf8] sm:$0xff]  ;;  %v5088_v20 = vld [vmem:[%s5863_s4 + $0x70] sm:$0xff] }
  0x2b   :  { %5907 = vst [vmem:[#allocation11_spill] sm:$0xff] %v5018_v10  ;;  %v5074_v18 = vld [vmem:[%s5863_s4 + $0x118] sm:$0xff]  ;;  %5916 = vst [vmem:[#allocation20_spill] sm:$0xff] %v5083_v19  ;;  %v884_v30 = vld [vmem:[%s5864_s2 + $0x10] sm:$0xff] }
  0x2c   :  { %5915 = vst [vmem:[#allocation19_spill] sm:$0xff] %v5074_v18  ;;  %5917 = vst [vmem:[#allocation21_spill] sm:$0xff] %v5088_v20  ;;  %v5099_v21 = vld [vmem:[%s5863_s4 + $0x78] sm:$0xff] }
  0x2d   :  { %3868 = vmatpush3.bf16.xpose.msk.msra.mxu0 %vm4344_vm1, %v3866_v11  ;;  %v152_v11 = vld [vmem:[%s5860_s1 + $0x2c0] sm:$0xff]  ;;  %5918 = vst [vmem:[#allocation22_spill] sm:$0xff] %v5099_v21  ;;  %vm5139_vm4 = vmpackc.low %vm1392_vm3, %vm1392_vm3 }
  0x2e   :  { %3871 = vmatprep.subr.msk.bf16.mxu0 %vm4344_vm1, %v3869_v14  ;;  %v168_v14 = vld [vmem:[%s5860_s1 + $0x340] sm:$0xff] }
  0x2f   :  { %3916 = vmatpush3.bf16.xpose.msk.msra.mxu1 %vm4344_vm1, %v3914_v15  ;;  %v169_v15 = vld [vmem:[%s5860_s1 + $0x348] sm:$0xff] }
  0x30   :  { %3919 = vmatprep.subr.msk.bf16.mxu1 %vm4344_vm1, %v3917_v16  ;;  %v3953_v16 = vpack.c.bf16 %v153_v12, %v152_v11  ;;  %v4001_v17 = vpack.c.bf16 %v169_v15, %v168_v14  ;;  %v5025_v11 = vld [vmem:[%s5863_s4 + $0x100] sm:$0xff]  ;;  %v5032_v12 = vld [vmem:[%s5863_s4 + $0x48] sm:$0xff]  ;;  %v5053_v15 = vld [vmem:[%s5863_s4 + $0x110] sm:$0xff] }
  0x31   :  { %5908 = vst [vmem:[#allocation12_spill] sm:$0xff] %v5025_v11  ;;  %5909 = vst [vmem:[#allocation13_spill] sm:$0xff] %v5032_v12  ;;  %v5046_v14 = vld [vmem:[%s5863_s4 + $0x108] sm:$0xff] }
  0x32   :  { %5911 = vst [vmem:[#allocation15_spill] sm:$0xff] %v5046_v14  ;;  %5912 = vst [vmem:[#allocation16_spill] sm:$0xff] %v5053_v15 }
  0x35   :  { %3874 = vmatpush3.bf16.xpose.msk.msra.mxu0 %vm4344_vm1, %v3872_v23  ;;  %v170_v23 = vld [vmem:[%s5860_s1 + $0x350] sm:$0xff] }
  0x36   :  { %3877 = vmatprep.subr.msk.bf16.mxu0 %vm4344_vm1, %v3875_v26  ;;  %v4007_v26 = vpack.c.bf16 %v171_v24, %v170_v23  ;;  %v5113_v23 = vld [vmem:[%s5863_s4 + $0x88] sm:$0xff]  ;;  %v5118_v24 = vld [vmem:[%s5863_s4 + $0x90] sm:$0xff] }
  0x37   :  { %3922 = vmatpush3.bf16.xpose.msk.msra.mxu1 %vm4344_vm1, %v3920_v27  ;;  %v138_v27 = vld [vmem:[%s5860_s1 + $0x250] sm:$0xff]  ;;  %5920 = vst [vmem:[#allocation24_spill] sm:$0xff] %v5113_v23  ;;  %5921 = vst [vmem:[#allocation25_spill] sm:$0xff] %v5118_v24 }
  0x38   :  { %3925 = vmatprep.subr.msk.bf16.mxu1 %vm4344_vm1, %v3923_v28  ;;  %v139_v28 = vld [vmem:[%s5860_s1 + $0x258] sm:$0xff] }
  0x39   :  { %v3962_v31 = vpack.c.bf16 %v139_v28, %v138_v27  ;;  %v883_v27 = vld [vmem:[%s5864_s2 + $0x8] sm:$0xff] }
  0x3d   :  { %3880 = vmatpush3.bf16.xpose.msk.msra.mxu0 %vm4344_vm1, %v3878_v35  ;;  %v4013_v35 = vpack.c.bf16 %v173_v33, %v172_v32  ;;  %v886_v33 = vld [vmem:[%s5864_s2 + $0x20] sm:$0xff] }
  0x3e   :  { %3931 = vmatprep.subr.msk.bf16.mxu0 %vm4344_vm1, %v3929_v38  ;;  %v158_v38 = vld [vmem:[%s5860_s1 + $0x2f0] sm:$0xff] }
  0x3f   :  { %3928 = vmatpush3.bf16.xpose.msk.msra.mxu1 %vm4344_vm1, %v3926_v39  ;;  %v159_v39 = vld [vmem:[%s5860_s1 + $0x2f8] sm:$0xff] }
  0x40   :  { %3979 = vmatprep.subr.msk.bf16.mxu1 %vm4344_vm1, %v3977_v40  ;;  %v3971_v44 = vpack.c.bf16 %v159_v39, %v158_v38 }
  0x44   :  { %3256 = vmatmul.mubr.msk.f32.vlgmr.msra.gmra.mrb[0].mxu0 %vm176_vm0, %v4451_v43 }
  0x45   :  { %3934 = vmatpush3.bf16.xpose.msk.msra.mxu0 %vm4344_vm1, %v3932_v46  ;;  %3257 = vmatprep.mubr.msk.f32.mxu0 %vm176_vm0, %v4644_v50  ;;  %v142_v46 = vld [vmem:[%s5860_s1 + $0x270] sm:$0xff] }
  0x46   :  { %3296 = vmatmul.mubr.msk.f32.vlgmr.msra.gmra.mrb[0].mxu1 %vm176_vm0, %v4451_v43  ;;  %3937 = vmatprep.subr.msk.bf16.mxu0 %vm4344_vm1, %v3935_v49  ;;  %v21_v49 = vld [vmem:[%s5862_s3 + $0x30] sm:$0xff] }
  0x47   :  { %3982 = vmatpush3.bf16.xpose.msk.msra.mxu1 %vm4344_vm1, %v3977_v40  ;;  %3297 = vmatprep.mubr.msk.f32.mxu1 %vm176_vm0, %v4644_v50  ;;  %v3968_v40 = vpack.c.bf16 %v141_v37, %v140_v36  ;;  %v4025_v52 = vpack.c.bf16 %v21_v49, %v20_v48  ;;  %v888_v36 = vld [vmem:[%s5864_s2 + $0x30] sm:$0xff]  ;;  %v889_v37 = vld [vmem:[%s5864_s2 + $0x38] sm:$0xff] }
  0x48   :  { %3985 = vmatprep.subr.msk.bf16.mxu1 %vm4344_vm1, %v3983_v51  ;;  %3258 = vmatmul.mubr.msk.f32.gmra.mrb[2].mxu0 %vm176_vm0, %v4644_v50  ;;  %v4051_v38 = vpack.c.bf16 %v889_v37, %v888_v36 }
  0x49   :  { %3259 = vmatprep.mubr.msk.f32.mxu0 %vm176_vm0, %v4665_v54 }
  0x4a   :  { %3298 = vmatmul.mubr.msk.f32.gmra.mrb[2].mxu1 %vm176_vm0, %v4644_v50 }
  0x4b   :  { %3299 = vmatprep.mubr.msk.f32.mxu1 %vm176_vm0, %v4665_v54 }
  0x4c   :  { %3260 = vmatmul.mubr.msk.f32.gmra.mrb[4].mxu0 %vm176_vm0, %v4665_v54 }
  0x4d   :  { %3940 = vmatpush3.bf16.xpose.msk.msra.mxu0 %vm4344_vm1, %v3938_v57  ;;  %3261 = vmatprep.mubr.msk.f32.mxu0 %vm176_vm0, %v4692_v61  ;;  %v4905_v57 = vld [vmem:[%s5863_s4] sm:$0xff] }
  0x4e   :  { %3943 = vmatprep.subr.msk.bf16.mxu0 %vm4344_vm1, %v3941_v60  ;;  %3300 = vmatmul.mubr.msk.f32.gmra.mrb[4].mxu1 %vm176_vm0, %v4665_v54  ;;  %v4927_v60 = vld [vmem:[%s5863_s4 + $0x10] sm:$0xff] }
  0x4f   :  { %3988 = vmatpush3.bf16.xpose.msk.msra.mxu1 %vm4344_vm1, %v3983_v51  ;;  %3301 = vmatprep.mubr.msk.f32.mxu1 %vm176_vm0, %v4692_v61  ;;  %v3974_v51 = vpack.c.bf16 %v143_v47, %v142_v46 }
  0x50   :  { %3991 = vmatprep.subr.msk.bf16.mxu1 %vm4344_vm1, %v3989_v62  ;;  %3262 = vmatmul.mubr.msk.f32.gmra.mrb[6].mxu0 %vm176_vm0, %v4692_v61 }
  0x51   :  { %3335 = vmatprep.mubr.msk.f32.mxu0 %vm176_vm0, %v4451_v43 }
  0x52   :  { %3302 = vmatmul.mubr.msk.f32.gmra.mrb[6].mxu1 %vm176_vm0, %v4692_v61 }
  0x53   :  { %3555 = vmatprep.mubr.msk.f32.mxu1 %vm176_vm0, %v4451_v43 }
  0x55   :  { %3946 = vmatpush3.bf16.xpose.msk.msra.mxu0 %vm4344_vm1, %v3944_v4  ;;  %v4976_v4 = vld [vmem:[%s5863_s4 + $0x28] sm:$0xff] }
  0x56   :  { %3949 = vmatprep.subr.msk.bf16.mxu0 %vm4344_vm1, %v3947_v7  ;;  %v4997_v7 = vld [vmem:[%s5863_s4 + $0xf0] sm:$0xff] }
  0x57   :  { %3994 = vmatpush3.bf16.xpose.msk.msra.mxu1 %vm4344_vm1, %v3989_v62  ;;  %v4941_v62 = vld [vmem:[%s5863_s4 + $0xd0] sm:$0xff]  ;;  %5904 = vst [vmem:[#allocation8_spill] sm:$0xff] %v4997_v7 }
  0x58   :  { %3997 = vmatprep.subr.msk.bf16.mxu1 %vm4344_vm1, %v3995_v8  ;;  %5899 = vst [vmem:[#allocation3_spill] sm:$0xff] %v4941_v62 }
  0x5d   :  { %3952 = vmatpush3.bf16.xpose.msk.msra.mxu0 %vm4344_vm1, %v3950_v13  ;;  %v5037_v13 = vld [vmem:[%s5863_s4 + $0x50] sm:$0xff] }
  0x5e   :  { %3955 = vmatprep.subr.msk.bf16.mxu0 %vm4344_vm1, %v3953_v16  ;;  %5910 = vst [vmem:[#allocation14_spill] sm:$0xff] %v5037_v13  ;;  %v5060_v16 = vld [vmem:[%s5863_s4 + $0x58] sm:$0xff] }
  0x5f   :  { %4000 = vmatpush3.bf16.xpose.msk.msra.mxu1 %vm4344_vm1, %v3995_v8  ;;  %v5004_v8 = vld [vmem:[%s5863_s4 + $0x38] sm:$0xff]  ;;  %5913 = vst [vmem:[#allocation17_spill] sm:$0xff] %v5060_v16 }
  0x60   :  { %4003 = vmatprep.subr.msk.bf16.mxu1 %vm4344_vm1, %v4001_v17  ;;  %5905 = vst [vmem:[#allocation9_spill] sm:$0xff] %v5004_v8 }
  0x65   :  { %3958 = vmatpush3.bf16.xpose.msk.msra.mxu0 %vm4344_vm1, %v3956_v22  ;;  %v5104_v22 = vld [vmem:[%s5863_s4 + $0x80] sm:$0xff] }
  0x66   :  { %3961 = vmatprep.subr.msk.bf16.mxu0 %vm4344_vm1, %v3959_v25  ;;  %5919 = vst [vmem:[#allocation23_spill] sm:$0xff] %v5104_v22  ;;  %v5127_v25 = vld [vmem:[%s5863_s4 + $0x98] sm:$0xff] }
  0x67   :  { %4006 = vmatpush3.bf16.xpose.msk.msra.mxu1 %vm4344_vm1, %v4001_v17  ;;  %v5065_v17 = vld [vmem:[%s5863_s4 + $0x60] sm:$0xff]  ;;  %5922 = vst [vmem:[#allocation26_spill] sm:$0xff] %v5127_v25 }
  0x68   :  { %4009 = vmatprep.subr.msk.bf16.mxu1 %vm4344_vm1, %v4007_v26  ;;  %5914 = vst [vmem:[#allocation18_spill] sm:$0xff] %v5065_v17 }
  0x6d   :  { %3964 = vmatpush3.bf16.xpose.msk.msra.mxu0 %vm4344_vm1, %v3962_v31  ;;  %v885_v31 = vld [vmem:[%s5864_s2 + $0x18] sm:$0xff] }
  0x6e   :  { %3967 = vmatprep.subr.msk.bf16.mxu0 %vm4344_vm1, %v3965_v34  ;;  %v4039_v32 = vpack.c.bf16 %v885_v31, %v884_v30  ;;  %v887_v34 = vld [vmem:[%s5864_s2 + $0x28] sm:$0xff] }
  0x6f   :  { %4012 = vmatpush3.bf16.xpose.msk.msra.mxu1 %vm4344_vm1, %v4007_v26  ;;  %v882_v26 = vld [vmem:[%s5864_s2] sm:$0xff] }
  0x70   :  { %4015 = vmatprep.subr.msk.bf16.mxu1 %vm4344_vm1, %v4013_v35  ;;  %v4033_v29 = vpack.c.bf16 %v883_v27, %v882_v26 }
  0x75   :  { %3970 = vmatpush3.bf16.xpose.msk.msra.mxu0 %vm4344_vm1, %v3968_v40 }
  0x76   :  { %3973 = vmatprep.subr.msk.bf16.mxu0 %vm4344_vm1, %v3971_v44 }
  0x77   :  { %4018 = vmatpush3.bf16.xpose.msk.msra.mxu1 %vm4344_vm1, %v4013_v35  ;;  %v4045_v35 = vpack.c.bf16 %v887_v34, %v886_v33  ;;  %v1252_v33 = vlaneseq }
  0x78   :  { %4021 = vmatprep.subr.msk.bf16.mxu1 %vm4344_vm1, %v4019_v45 }
  0x7d   :  { %3976 = vmatpush3.bf16.xpose.msk.msra.mxu0 %vm4344_vm1, %v3974_v51 }
  0x7e   :  { %4026 = vmatprep.subr.bf16.mxu0 %v4025_v52 }
  0x7f   :  { %4024 = vmatpush3.bf16.xpose.msk.msra.mxu1 %vm4344_vm1, %v4019_v45 }
  0x80   :  { %4209 = vmatprep.subr.bf16.mxu1 %v4025_v52 }
  0x84   :  { %3336 = vmatmul.mubr.msk.f32.vlgmr.msra.gmra.mrb[8].mxu0 %vm176_vm0, %v4451_v43  ;;  %v45_v43 = vld [vmem:[%s5863_s4 + $0xa8] sm:$0xff] }
  0x85   :  { %4028 = vmatpush3.bf16.msra.mxu0 %v4025_v52  ;;  %3337 = vmatprep.mubr.msk.f32.mxu0 %vm176_vm0, %v4644_v50 }
  0x86   :  { %4030 = vmatprep.subr.bf16.mxu0 %v4029_v56  ;;  %3556 = vmatmul.mubr.msk.f32.vlgmr.msra.gmra.mrb[8].mxu1 %vm176_vm0, %v4644_v50 }
  0x87   :  { %4211 = vmatpush3.bf16.msra.mxu1 %v4025_v52  ;;  %3558 = vmatprep.mubr.msk.f32.mxu1 %vm176_vm0, %v4665_v54 }
  0x88   :  { %3338 = vmatmul.mubr.msk.f32.gmra.mrb[10].mxu0 %vm176_vm0, %v4644_v50  ;;  %4210 = vmatprep.subr.bf16.mxu1 %v4029_v56  ;;  %v46_v50 = vld [vmem:[%s5863_s4 + $0xb0] sm:$0xff] }
  0x89   :  { %3339 = vmatprep.mubr.msk.f32.mxu0 %vm176_vm0, %v4665_v54  ;;  %4032 = vmatpush3.bf16.msra.mxu0 %v4029_v56 }
  0x8a   :  { %3559 = vmatmul.mubr.msk.f32.gmra.mrb[10].mxu1 %vm176_vm0, %v4692_v61  ;;  %4035 = vmatprep.subr.msk.bf16.mxu0 %vm5139_vm4, %v4033_v29 }
  0x8b   :  { %4212 = vmatpush3.bf16.msra.mxu1 %v4029_v56  ;;  %3599 = vmatprep.mubr.msk.f32.mxu1 %vm898_vm2, %v44_v2 }
  0x8c   :  { %3340 = vmatmul.mubr.msk.f32.gmra.mrb[12].mxu0 %vm176_vm0, %v4665_v54  ;;  %v47_v54 = vld [vmem:[%s5863_s4 + $0xb8] sm:$0xff] }
  0x8d   :  { %3341 = vmatprep.mubr.msk.f32.mxu0 %vm176_vm0, %v4692_v61 }
  0x8e   :  { %3600 = vmatmul.mubr.msk.f32.vlgmr.msra.gmra.mrb[12].mxu1 %vm898_vm2, %v45_v43 }
  0x8f   :  { %3602 = vmatprep.mubr.msk.f32.mxu1 %vm898_vm2, %v46_v50 }
  0x90   :  { %3342 = vmatmul.mubr.msk.f32.gmra.mrb[14].mxu0 %vm176_vm0, %v4692_v61  ;;  %v4934_v61 = vld [vmem:[%s5863_s4 + $0xc8] sm:$0xff] }
  0x91   :  { %3569 = vmatprep.mubr.msk.f32.mxu0 %vm898_vm2, %v4905_v57  ;;  %5898 = vst [vmem:[#allocation2_spill] sm:$0xff] %v4934_v61 }
  0x92   :  { %3603 = vmatmul.mubr.msk.f32.gmra.mrb[14].mxu1 %vm898_vm2, %v47_v54 }
  0x93   :  { %3605 = vmatprep.mubr.msk.f32.mxu1 %vm898_vm2, %v48_v58 }
  0x94   :  { %3570 = vmatmul.mubr.msk.f32.vlgmr.msra.gmra.mrb[16].mxu0 %vm898_vm2, %v4922_v59 }
  0x95   :  { %3572 = vmatprep.mubr.msk.f32.mxu0 %vm898_vm2, %v4927_v60  ;;  %4038 = vmatpush3.bf16.xpose.msk.msra.mxu0 %vm5139_vm4, %v4033_v29 }
  0x96   :  { %3606 = vmatmul.mubr.msk.f32.gmra.mrb[16].mxu1 %vm898_vm2, %v4934_v61  ;;  %4041 = vmatprep.subr.msk.bf16.mxu0 %vm5139_vm4, %v4039_v32 }
  0x97   :  { %3608 = vmatprep.mubr.msk.f32.mxu1 %vm898_vm2, %v4941_v62 }
  0x98   :  { %3573 = vmatmul.mubr.msk.f32.gmra.mrb[18].mxu0 %vm898_vm2, %v4948_v63 }
  0x99   :  { %3575 = vmatprep.mubr.msk.f32.mxu0 %vm898_vm2, %v4953_v0 }
  0x9a   :  { %3609 = vmatmul.mubr.msk.f32.gmra.mrb[18].mxu1 %vm898_vm2, %v4962_v1 }
  0x9b   :  { %3611 = vmatprep.mubr.msk.f32.mxu1 %vm898_vm2, %v4969_v3 }
  0x9c   :  { %3576 = vmatmul.mubr.msk.f32.gmra.mrb[20].mxu0 %vm898_vm2, %v4976_v4 }
  0x9d   :  { %3578 = vmatprep.mubr.msk.f32.mxu0 %vm898_vm2, %v4981_v5  ;;  %4044 = vmatpush3.bf16.xpose.msk.msra.mxu0 %vm5139_vm4, %v4039_v32 }
  0x9e   :  { %3612 = vmatmul.mubr.msk.f32.gmra.mrb[20].mxu1 %vm898_vm2, %v4990_v6  ;;  %4047 = vmatprep.subr.msk.bf16.mxu0 %vm5139_vm4, %v4045_v35 }
  0x9f   :  { %3614 = vmatprep.mubr.msk.f32.mxu1 %vm898_vm2, %v4997_v7 }
  0xa0   :  { %3579 = vmatmul.mubr.msk.f32.gmra.mrb[22].mxu0 %vm898_vm2, %v5004_v8 }
  0xa1   :  { %3581 = vmatprep.mubr.msk.f32.mxu0 %vm898_vm2, %v5009_v9 }
  0xa2   :  { %3615 = vmatmul.mubr.msk.f32.gmra.mrb[22].mxu1 %vm898_vm2, %v5018_v10 }
  0xa3   :  { %3617 = vmatprep.mubr.msk.f32.mxu1 %vm898_vm2, %v5025_v11 }
  0xa4   :  { %3582 = vmatmul.mubr.msk.f32.gmra.mrb[24].mxu0 %vm898_vm2, %v5032_v12 }
  0xa5   :  { %3584 = vmatprep.mubr.msk.f32.mxu0 %vm898_vm2, %v5037_v13  ;;  %4050 = vmatpush3.bf16.xpose.msk.msra.mxu0 %vm5139_vm4, %v4045_v35 }
  0xa6   :  { %3618 = vmatmul.mubr.msk.f32.gmra.mrb[24].mxu1 %vm898_vm2, %v5046_v14  ;;  %4053 = vmatprep.subr.msk.bf16.mxu0 %vm5139_vm4, %v4051_v38 }
  0xa7   :  { %3620 = vmatprep.mubr.msk.f32.mxu1 %vm898_vm2, %v5053_v15 }
  0xa8   :  { %3585 = vmatmul.mubr.msk.f32.gmra.mrb[26].mxu0 %vm898_vm2, %v5060_v16 }
  0xa9   :  { %3587 = vmatprep.mubr.msk.f32.mxu0 %vm898_vm2, %v5065_v17 }
  0xaa   :  { %3621 = vmatmul.mubr.msk.f32.gmra.mrb[26].mxu1 %vm898_vm2, %v5074_v18 }
  0xac   :  { %3588 = vmatmul.mubr.msk.f32.gmra.mrb[28].mxu0 %vm898_vm2, %v5083_v19 }
  0xad   :  { %3590 = vmatprep.mubr.msk.f32.mxu0 %vm898_vm2, %v5088_v20  ;;  %4056 = vmatpush3.bf16.xpose.msk.msra.mxu0 %vm5139_vm4, %v4051_v38  ;;  %v5233_v38 = vshrl.u32 %v1252_v33, 7 }
  0xaf   :  { %v5881_v14 = vsub.s32 2, %v5233_v38 }
  0xb0   :  { %3591 = vmatmul.mubr.msk.f32.gmra.mrb[30].mxu0 %vm898_vm2, %v5099_v21 }
  0xb1   :  { %3593 = vmatprep.mubr.msk.f32.mxu0 %vm898_vm2, %v5104_v22 }
  0xb4   :  { %3594 = vmatmul.mubr.msk.f32.gmra.mrb[32].mxu0 %vm898_vm2, %v5113_v23 }
  0xb5   :  { %3596 = vmatprep.mubr.msk.f32.mxu0 %vm898_vm2, %v5118_v24 }
  0xb8   :  { %3597 = vmatmul.mubr.msk.f32.gmra.mrb[34].mxu0 %vm898_vm2, %v5127_v25 }
 0x117   :  { %v591_v39 = vpop.f32.mrb[0].mxu0 }
 0x118   :  { %v5177_v40 = vpop.f32.mrb[1].mxu0  ;;  %v5265_v3 = vadd.f32 1.0, %v591_v39 }
 0x119   :  { %v5179_v41 = vpop.f32.mrb[0].mxu1 }
 0x11a   :  { %v5181_v42 = vpop.f32.mrb[1].mxu1 }
 0x11b   :  { %5925 = vst [vmem:[#allocation27_spill] sm:$0xff] %v5181_v42  ;;  %v597_v44 = vpop.f32.mrb[2].mxu0 }
 0x11c   :  { %v5183_v45 = vpop.f32.mrb[3].mxu0  ;;  %v5267_v62 = vadd.f32 1.0, %v597_v44 }
 0x11d   :  { %v5185_v46 = vpop.f32.mrb[2].mxu1 }
 0x11e   :  { %v5187_v47 = vpop.f32.mrb[3].mxu1  ;;  %v1361_v44 = vmul.f32 %v5267_v62, %v5267_v62 }
 0x11f   :  { %5926 = vst [vmem:[#allocation28_spill] sm:$0xff] %v5187_v47  ;;  %v5189_v48 = vpop.f32.mrb[4].mxu0 }
 0x120   :  { %v5191_v49 = vpop.f32.mrb[5].mxu0 }
 0x121   :  { %v5193_v51 = vpop.f32.mrb[4].mxu1 }
 0x122   :  { %v5195_v52 = vpop.f32.mrb[5].mxu1 }
 0x123   :  { %5927 = vst [vmem:[#allocation29_spill] sm:$0xff] %v5195_v52  ;;  %v5197_v53 = vpop.f32.mrb[6].mxu0 }
 0x124   :  { %v5199_v55 = vpop.f32.mrb[7].mxu0 }
 0x125   :  { %v5201_v56 = vpop.f32.mrb[6].mxu1 }
 0x126   :  { %v5203_v2 = vpop.f32.mrb[7].mxu1 }
 0x127   :  { %5928 = vst [vmem:[#allocation30_spill] sm:$0xff] %v5203_v2 }
 0x157   :  { %v5205_v43 = vpop.f32.mrb[8].mxu0 }
 0x158   :  { %5929 = vst [vmem:[#allocation31_spill] sm:$0xff] %v5205_v43  ;;  %v5207_v50 = vpop.f32.mrb[9].mxu0 }
 0x159   :  { %5930 = vst [vmem:[#allocation32_spill] sm:$0xff] %v5207_v50  ;;  %v5209_v54 = vpop.f32.mrb[8].mxu1 }
 0x15a   :  { %5931 = vst [vmem:[#allocation33_spill] sm:$0xff] %v5209_v54  ;;  %v5211_v58 = vpop.f32.mrb[9].mxu1  ;;  %v5872_v54 = vsub.s32 0, %v5233_v38 }
 0x15b   :  { %5932 = vst [vmem:[#allocation34_spill] sm:$0xff] %v5211_v58  ;;  %v5213_v26 = vpop.f32.mrb[10].mxu0 }
 0x15c   :  { %5933 = vst [vmem:[#allocation35_spill] sm:$0xff] %v5213_v26  ;;  %v5215_v27 = vpop.f32.mrb[11].mxu0 }
 0x15d   :  { %5934 = vst [vmem:[#allocation36_spill] sm:$0xff] %v5215_v27  ;;  %v5217_v29 = vpop.f32.mrb[10].mxu1  ;;  %v5244_v27 = vld [vmem:[%s5862_s3] sm:$0xff] }
 0x15e   :  { %5935 = vst [vmem:[#allocation37_spill] sm:$0xff] %v5217_v29  ;;  %v5219_v30 = vpop.f32.mrb[11].mxu1 }
 0x15f   :  { %5936 = vst [vmem:[#allocation38_spill] sm:$0xff] %v5219_v30  ;;  %v5221_v31 = vpop.f32.mrb[12].mxu0 }
 0x160   :  { %5937 = vst [vmem:[#allocation39_spill] sm:$0xff] %v5221_v31  ;;  %v5223_v32 = vpop.f32.mrb[13].mxu0 }
 0x161   :  { %5938 = vst [vmem:[#allocation40_spill] sm:$0xff] %v5223_v32  ;;  %v5225_v34 = vpop.f32.mrb[12].mxu1  ;;  %v5875_v32 = vsub.s32 1, %v5233_v38 }
 0x162   :  { %v5227_v35 = vpop.f32.mrb[13].mxu1 }
 0x163   :  { %v5229_v36 = vpop.f32.mrb[14].mxu0  ;;  %v1263_v26 = vrot.slane %v5244_v27, %v5875_v32 }
 0x164   :  { %5939 = vst [vmem:[#allocation41_spill] sm:$0xff] %v5229_v36  ;;  %v5231_v37 = vpop.f32.mrb[15].mxu0  ;;  %v1255_v36 = vrot.slane %v5244_v27, %v5872_v54 }
 0x165   :  { %5940 = vst [vmem:[#allocation42_spill] sm:$0xff] %v5231_v37  ;;  %v5235_v58 = vpop.f32.mrb[14].mxu1 }
 0x166   :  { %v5237_v29 = vpop.f32.mrb[15].mxu1 }
 0x167   :  { %v3571_v30 = vpop.f32.mrb[16].mxu0 }
 0x168   :  { %v1073_v50 = vpop.f32.mrb[17].mxu0  ;;  %v1257_v47 = vmul.f32 %v3571_v30, %v1255_v36 }
 0x169   :  { %v5246_v31 = vpop.f32.mrb[16].mxu1  ;;  %v1256_v11 = vmul.f32 %v1255_v36, %v1073_v50 }
 0x16a   :  { %v5248_v37 = vpop.f32.mrb[17].mxu1 }
 0x16b   :  { %v3574_v33 = vpop.f32.mrb[18].mxu0 }
 0x16c   :  { %v1083_v43 = vpop.f32.mrb[19].mxu0  ;;  %v1259_v61 = vmul.f32 %v3574_v33, %v1255_v36 }
 0x16d   :  { %v5256_v52 = vpop.f32.mrb[18].mxu1  ;;  %v1258_v50 = vmul.f32 %v1255_v36, %v1083_v43 }
 0x16e   :  { %v5258_v2 = vpop.f32.mrb[19].mxu1 }
 0x16f   :  { %v3577_v42 = vpop.f32.mrb[20].mxu0 }
 0x170   :  { %v1265_v18 = vmul.f32 %v3577_v42, %v1263_v26  ;;  %v1093_v15 = vpop.f32.mrb[21].mxu0  ;;  %v1275_v42 = vrot.slane %v5244_v27, %v5881_v14 }
 0x171   :  { %v1264_v10 = vmul.f32 %v1263_v26, %v1093_v15  ;;  %v5261_v7 = vpop.f32.mrb[20].mxu1 }
 0x172   :  { %v1269_v54 = vadd.f32 %v1265_v18, %v1257_v47  ;;  %v5263_v6 = vpop.f32.mrb[21].mxu1 }
 0x173   :  { %v1268_v32 = vadd.f32 %v1264_v10, %v1256_v11  ;;  %v3580_v1 = vpop.f32.mrb[22].mxu0  ;;  %v1360_v10 = vmul.f32 %v5265_v3, %v5265_v3 }
 0x174   :  { %v1267_v25 = vmul.f32 %v3580_v1, %v1263_v26  ;;  %v1103_v30 = vpop.f32.mrb[23].mxu0  ;;  %v3099_v1 = vld [vmem:[%s5862_s3 + $0x9] ss:$0 sm:$0xff] }
 0x175   :  { %v1266_v15 = vmul.f32 %v1263_v26, %v1103_v30  ;;  %v5272_v24 = vpop.f32.mrb[22].mxu1  ;;  %v5889_v26 = vsub.s32 3, %v5233_v38  ;;  %v5290_v30 = vadd.f32 1.0, %v5189_v48  ;;  %v1368_v14 = vmul.f32 %v3099_v1, %v1360_v10 }
 0x176   :  { %v1271_v18 = vadd.f32 %v1267_v25, %v1259_v61  ;;  %v5274_v47 = vpop.f32.mrb[23].mxu1  ;;  %v5285_v61 = vadd.f32 1.0, %v5197_v53  ;;  %v1369_v21 = vmul.f32 %v3099_v1, %v1361_v44 }
 0x177   :  { %v1270_v11 = vadd.f32 %v1266_v15, %v1258_v50  ;;  %v3583_v39 = vpop.f32.mrb[24].mxu0  ;;  %v1287_v53 = vrot.slane %v5244_v27, %v5889_v26  ;;  %v1362_v48 = vmul.f32 %v5290_v30, %v5290_v30  ;;  %v1298_v26 = vsub.s32 4, %v5233_v38 }
 0x178   :  { %v1277_v33 = vmul.f32 %v3583_v39, %v1275_v42  ;;  %v1113_v43 = vpop.f32.mrb[25].mxu0 }
 0x179   :  { %v1276_v25 = vmul.f32 %v1275_v42, %v1113_v43  ;;  %v5287_v36 = vpop.f32.mrb[24].mxu1  ;;  %v1363_v43 = vmul.f32 %v5285_v61, %v5285_v61  ;;  %v1370_v9 = vmul.f32 %v3099_v1, %v1362_v48 }
 0x17a   :  { %v1281_v50 = vadd.f32 %v1277_v33, %v1269_v54  ;;  %v5292_v15 = vpop.f32.mrb[25].mxu1  ;;  %v1373_v33 = vadd.f32 1e-06, %v1369_v21  ;;  %v1299_v21 = vrot.slane %v5244_v27, %v1298_v26 }
 0x17b   :  { %v1280_v23 = vadd.f32 %v1276_v25, %v1268_v32  ;;  %v3586_v22 = vpop.f32.mrb[26].mxu0  ;;  %v1372_v32 = vadd.f32 1e-06, %v1368_v14  ;;  %v1371_v13 = vmul.f32 %v3099_v1, %v1363_v43  ;;  %v1374_v43 = vadd.f32 1e-06, %v1370_v9 }
 0x17c   :  { %v1279_v39 = vmul.f32 %v3586_v22, %v1275_v42  ;;  %v1123_v20 = vpop.f32.mrb[27].mxu0 }
 0x17d   :  { %v1278_v19 = vmul.f32 %v1275_v42, %v1123_v20  ;;  %v5299_v17 = vpop.f32.mrb[26].mxu1  ;;  %v1310_v20 = vsub.s32 5, %v5233_v38  ;;  %4213 = vrsqrt.f32 %v1372_v32 }
 0x17e   :  { %v1283_v54 = vadd.f32 %v1279_v39, %v1271_v18  ;;  %v5303_v10 = vpop.f32.mrb[27].mxu1  ;;  %4215 = vrsqrt.f32 %v1373_v33  ;;  %v1322_v18 = vsub.s32 6, %v5233_v38 }
 0x17f   :  { %v1282_v44 = vadd.f32 %v1278_v19, %v1270_v11  ;;  %v3589_v22 = vpop.f32.mrb[28].mxu0  ;;  %v1375_v11 = vadd.f32 1e-06, %v1371_v13 }
 0x180   :  { %v1289_v25 = vmul.f32 %v3589_v22, %v1287_v53  ;;  %v1133_v16 = vpop.f32.mrb[29].mxu0 }
 0x181   :  { %v1288_v12 = vmul.f32 %v1287_v53, %v1133_v16  ;;  %v1311_v16 = vrot.slane %v5244_v27, %v1310_v20  ;;  %4217 = vrsqrt.f32 %v1375_v11 }
 0x182   :  { %v1293_v42 = vadd.f32 %v1289_v25, %v1281_v50  ;;  %4219 = vrsqrt.f32 %v1374_v43  ;;  %v3098_v25 = vld [vmem:[%s5862_s3 + $0x8] ss:$0 sm:$0xff] }
 0x183   :  { %v1292_v8 = vadd.f32 %v1288_v12, %v1280_v23  ;;  %v3592_v5 = vpop.f32.mrb[30].mxu0  ;;  %v5895_v12 = vsub.s32 7, %v5233_v38  ;;  %v1313_v9 = vmul.f32 %v5225_v34, %v1311_v16 }
 0x184   :  { %v1291_v14 = vmul.f32 %v3592_v5, %v1287_v53  ;;  %v1143_v19 = vpop.f32.mrb[31].mxu0  ;;  %v1323_v5 = vrot.slane %v5244_v27, %v1322_v18 }
 0x185   :  { %v1290_v39 = vmul.f32 %v1287_v53, %v1143_v19  ;;  %v1335_v13 = vrot.slane %v5244_v27, %v5895_v12  ;;  %v1349_v12 = vmul.f32 %v5287_v36, %v3098_v25 }
 0x186   :  { %v1295_v1 = vadd.f32 %v1291_v14, %v1283_v54  ;;  %v1312_v54 = vmul.f32 %v1311_v16, %v5227_v35  ;;  %v1315_v14 = vmul.f32 %v5235_v58, %v1311_v16  ;;  %v1325_v19 = vmul.f32 %v5246_v31, %v1323_v5 }
 0x187   :  { %v1294_v23 = vadd.f32 %v1290_v39, %v1282_v44  ;;  %v3595_v50 = vpop.f32.mrb[32].mxu0  ;;  %v4214_v43 = vpop.eup %4213  ;;  %v1324_v27 = vmul.f32 %v1323_v5, %v5248_v37  ;;  %v1336_v58 = vmul.f32 %v1335_v13, %v5263_v6  ;;  %v1339_v36 = vmul.f32 %v5272_v24, %v1335_v13 }
 0x188   :  { %v1301_v48 = vmul.f32 %v3595_v50, %v1299_v21  ;;  %v1153_v32 = vpop.f32.mrb[33].mxu0  ;;  %v1314_v50 = vmul.f32 %v1311_v16, %v5237_v29  ;;  %v1327_v29 = vmul.f32 %v5256_v52, %v1323_v5  ;;  %v1350_v52 = vmul.f32 %v3098_v25, %v5303_v10  ;;  %v890_v10 = vld [vmem:[%s5864_s2 + $0x40] sm:$0xff] }
 0x189   :  { %v1300_v22 = vmul.f32 %v1299_v21, %v1153_v32 }
 0x18a   :  { %v1305_v53 = vadd.f32 %v1301_v48, %v1293_v42  ;;  %v1337_v48 = vmul.f32 %v5261_v7, %v1335_v13  ;;  %v1326_v7 = vmul.f32 %v1323_v5, %v5258_v2 }
 0x18b   :  { %v1304_v44 = vadd.f32 %v1300_v22, %v1292_v8  ;;  %v3598_v33 = vpop.f32.mrb[34].mxu0  ;;  %v4216_v8 = vpop.eup %4215 }
 0x18c   :  { %v1317_v11 = vadd.f32 %v1313_v9, %v1305_v53  ;;  %v1303_v39 = vmul.f32 %v3598_v33, %v1299_v21  ;;  %v1163_v34 = vpop.f32.mrb[35].mxu0  ;;  %v1348_v53 = vmul.f32 %v3098_v25, %v5292_v15  ;;  %v1380_v33 = vmul.f32 %v4214_v43, %v5265_v3 }
 0x18d   :  { %v1316_v42 = vadd.f32 %v1312_v54, %v1304_v44  ;;  %v1302_v35 = vmul.f32 %v1299_v21, %v1163_v34  ;;  %v1381_v21 = vmul.f32 %v4216_v8, %v5267_v62  ;;  %v1338_v15 = vmul.f32 %v1335_v13, %v5274_v47  ;;  %v892_v13 = vld [vmem:[%s5864_s2 + $0x50] sm:$0xff] }
 0x18e   :  { %v1307_v32 = vadd.f32 %v1303_v39, %v1295_v1  ;;  %v1329_v22 = vadd.f32 %v1325_v19, %v1317_v11  ;;  %v4218_v19 = vpop.eup %4217  ;;  %v896_v8 = vld [vmem:[%s5864_s2 + $0x70] sm:$0xff] }
 0x18f   :  { %v1306_v31 = vadd.f32 %v1302_v35, %v1294_v23  ;;  %v1328_v9 = vadd.f32 %v1324_v27, %v1316_v42  ;;  %v1351_v23 = vmul.f32 %v5299_v17, %v3098_v25  ;;  %v1383_v5 = vmul.f32 %v4218_v19, %v5285_v61  ;;  %v891_v61 = vld [vmem:[%s5864_s2 + $0x48] sm:$0xff]  ;;  %v893_v25 = vld [vmem:[%s5864_s2 + $0x58] sm:$0xff]  ;;  %v894_v27 = vld [vmem:[%s5864_s2 + $0x60] sm:$0xff] }
 0x190   :  { %v1319_v37 = vadd.f32 %v1315_v14, %v1307_v32  ;;  %v1341_v16 = vadd.f32 %v1337_v48, %v1329_v22  ;;  %v4220_v14 = vpop.eup %4219  ;;  %v895_v42 = vld [vmem:[%s5864_s2 + $0x68] sm:$0xff]  ;;  %v897_v48 = vld [vmem:[%s5864_s2 + $0x78] sm:$0xff]  ;;  %v1389_v22 = vadd.f32 1.0, %v5183_v45 }
 0x191   :  { %v1318_v1 = vadd.f32 %v1314_v50, %v1306_v31  ;;  %v1340_v54 = vadd.f32 %v1336_v58, %v1328_v9  ;;  %v1382_v24 = vmul.f32 %v4220_v14, %v5290_v30  ;;  %v4057_v30 = vpack.c.bf16 %v891_v61, %v890_v10 }
 0x192   :  { %v1353_v44 = vadd.f32 %v1349_v12, %v1341_v16  ;;  %v1331_v6 = vadd.f32 %v1327_v29, %v1319_v37  ;;  %v4063_v50 = vpack.c.bf16 %v893_v25, %v892_v13  ;;  %v4069_v35 = vpack.c.bf16 %v895_v42, %v894_v27  ;;  %v3112_v29 = vld [vmem:[%s5862_s3 + $0xa] ss:$0 sm:$0xff] }
 0x193   :  { %v1352_v3 = vadd.f32 %v1348_v53, %v1340_v54  ;;  %v1330_v11 = vadd.f32 %v1326_v7, %v1318_v1  ;;  %4059 = vmatprep.subr.msk.bf16.mxu0 %vm5139_vm4, %v4057_v30  ;;  %v4075_v32 = vpack.c.bf16 %v897_v48, %v896_v8  ;;  %v1388_v58 = vadd.f32 1.0, %v5177_v40 }
 0x194   :  { %v1385_v39 = vmul.f32 %v1381_v21, %v1353_v44  ;;  %v1343_v62 = vadd.f32 %v1339_v36, %v1331_v6  ;;  %v1515_v31 = vmul.f32 %v1389_v22, %v1389_v22  ;;  %v1391_v9 = vadd.f32 1.0, %v5199_v55 }
 0x195   :  { %v1384_v34 = vmul.f32 %v1380_v33, %v1352_v3  ;;  %v1342_v2 = vadd.f32 %v1338_v15, %v1330_v11  ;;  %v1514_v53 = vmul.f32 %v1388_v58, %v1388_v58  ;;  %v1390_v33 = vadd.f32 1.0, %v5191_v49 }
 0x196   :  { %v1355_v43 = vadd.f32 %v1351_v23, %v1343_v62  ;;  %v1523_v37 = vmul.f32 %v3112_v29, %v1515_v31  ;;  %v1517_v16 = vmul.f32 %v1391_v9, %v1391_v9 }
 0x197   :  { %v1354_v12 = vadd.f32 %v1350_v52, %v1342_v2  ;;  %3639 = vmatprep.mubr.msk.f32.mxu0 %vm1392_vm3, %v1384_v34  ;;  %v1522_v21 = vmul.f32 %v3112_v29, %v1514_v53  ;;  %v1516_v7 = vmul.f32 %v1390_v33, %v1390_v33 }
 0x198   :  { %v1387_v17 = vmul.f32 %v1383_v5, %v1355_v43  ;;  %3640 = vmatmul.mubr.msk.f32.vlgmr.msra.gmra.mrb[36].mxu0 %vm1392_vm3, %v1385_v39  ;;  %v1527_v1 = vadd.f32 1e-06, %v1523_v37  ;;  %v1525_v54 = vmul.f32 %v3112_v29, %v1517_v16 }
 0x199   :  { %v1386_v47 = vmul.f32 %v1382_v24, %v1354_v12  ;;  %4062 = vmatpush3.bf16.xpose.msk.msra.mxu0 %vm5139_vm4, %v4057_v30  ;;  %v1526_v36 = vadd.f32 1e-06, %v1522_v21  ;;  %v1524_v45 = vmul.f32 %v3112_v29, %v1516_v7 }
 0x19a   :  { %4065 = vmatprep.subr.msk.bf16.mxu0 %vm5139_vm4, %v4063_v50  ;;  %4221 = vrsqrt.f32 %v1527_v1  ;;  %v1529_v40 = vadd.f32 1e-06, %v1525_v54 }
 0x19b   :  { %3642 = vmatprep.mubr.msk.f32.mxu0 %vm1392_vm3, %v1386_v47  ;;  %4223 = vrsqrt.f32 %v1526_v36  ;;  %v1528_v44 = vadd.f32 1e-06, %v1524_v45 }
 0x19c   :  { %3643 = vmatmul.mubr.msk.f32.gmra.mrb[38].mxu0 %vm1392_vm3, %v1387_v17  ;;  %4225 = vrsqrt.f32 %v1529_v40 }
 0x19d   :  { %4227 = vrsqrt.f32 %v1528_v44 }
 0x1a1   :  { %4068 = vmatpush3.bf16.xpose.msk.msra.mxu0 %vm5139_vm4, %v4063_v50 }
 0x1a2   :  { %4071 = vmatprep.subr.msk.bf16.mxu0 %vm5139_vm4, %v4069_v35 }
 0x1a4   :  { %v4222_v55 = vpop.eup %4221 }
 0x1a5   :  { %v4224_v49 = vpop.eup %4223  ;;  %v1535_v6 = vmul.f32 %v4222_v55, %v1389_v22 }
 0x1a6   :  { %v4226_v23 = vpop.eup %4225  ;;  %v1534_v15 = vmul.f32 %v4224_v49, %v1388_v58 }
 0x1a7   :  { %v4228_v3 = vpop.eup %4227  ;;  %v1537_v62 = vmul.f32 %v4226_v23, %v1391_v9 }
 0x1a8   :  { %v1536_v5 = vmul.f32 %v4228_v3, %v1390_v33 }
 0x1a9   :  { %4074 = vmatpush3.bf16.xpose.msk.msra.mxu0 %vm5139_vm4, %v4069_v35 }
 0x1aa   :  { %4077 = vmatprep.subr.msk.bf16.mxu0 %vm5139_vm4, %v4075_v32 }
 0x1b1   :  { %4080 = vmatpush3.bf16.xpose.msk.msra.mxu0 %vm5139_vm4, %v4075_v32 }
 0x26b   :  { %v3641_v19 = vpop.f32.mrb[36].mxu0 }
 0x26c   :  { %v5395_v11 = vmul.f32 %v3641_v19, %v1535_v6  ;;  %v1495_v52 = vpop.f32.mrb[37].mxu0 }
 0x26d   :  { %v5397_v14 = vmul.f32 %v1534_v15, %v1495_v52 }
 0x26e   :  { %v5400_v39 = vmul.f32 0.70710677, %v5395_v11 }
 0x26f   :  { %v5403_v34 = vmul.f32 0.70710677, %v5397_v14  ;;  %v3644_v2 = vpop.f32.mrb[38].mxu0 }
 0x270   :  { %v1547_v43 = vand.u32 2147483647, %v5400_v39  ;;  %v5406_v24 = vmul.f32 %v3644_v2, %v1537_v62  ;;  %v1505_v12 = vpop.f32.mrb[39].mxu0  ;;  %vm1627_vm5 = vcmp.ge.f32.partialorder %v5400_v39, 0.0 }
 0x271   :  { %v1546_v17 = vand.u32 2147483647, %v5403_v34  ;;  %v5409_v47 = vmul.f32 %v1536_v5, %v1505_v12  ;;  %vm1626_vm6 = vcmp.ge.f32.partialorder %v5403_v34, 0.0 }
 0x272   :  { %v1551_v10 = vmul.f32 0.3275911, %v1547_v43  ;;  %v5412_v61 = vmul.f32 0.70710677, %v5406_v24  ;;  %v1603_v22 = vsub.f32 0.0, %v1547_v43 }
 0x273   :  { %v1550_v30 = vmul.f32 0.3275911, %v1546_v17  ;;  %v5415_v13 = vmul.f32 0.70710677, %v5409_v47  ;;  %v1602_v58 = vsub.f32 0.0, %v1546_v17 }
 0x274   :  { %v1555_v25 = vadd.f32 1.0, %v1551_v10  ;;  %v1549_v50 = vand.u32 2147483647, %v5412_v61  ;;  %v1607_v9 = vmul.f32 %v1603_v22, %v1547_v43  ;;  %vm1629_vm7 = vcmp.ge.f32.partialorder %v5412_v61, 0.0 }
 0x275   :  { %v1554_v27 = vadd.f32 1.0, %v1550_v30  ;;  %v1548_v42 = vand.u32 2147483647, %v5415_v13  ;;  %v1606_v37 = vmul.f32 %v1602_v58, %v1546_v17  ;;  %vm1628_vm8 = vcmp.ge.f32.partialorder %v5415_v13, 0.0 }
 0x276   :  { %4229 = vrcp.f32 %v1555_v25  ;;  %v1553_v35 = vmul.f32 0.3275911, %v1549_v50  ;;  %v1605_v53 = vsub.f32 0.0, %v1549_v50  ;;  %v1612_v54 = vmul.f32 1.442695, %v1607_v9 }
 0x277   :  { %4231 = vrcp.f32 %v1554_v27  ;;  %v1552_v8 = vmul.f32 0.3275911, %v1548_v42  ;;  %v1604_v16 = vsub.f32 0.0, %v1548_v42  ;;  %v1610_v55 = vmul.f32 1.442695, %v1606_v37 }
 0x278   :  { %v1557_v48 = vadd.f32 1.0, %v1553_v35  ;;  %v1609_v45 = vmul.f32 %v1605_v53, %v1549_v50  ;;  %v1651_v61 = vadd.f32 1.0, %v5185_v46 }
 0x279   :  { %v1556_v32 = vadd.f32 1.0, %v1552_v8  ;;  %v1608_v6 = vmul.f32 %v1604_v16, %v1548_v42 }
 0x27a   :  { %4233 = vrcp.f32 %v1557_v48  ;;  %v1616_v62 = vmul.f32 1.442695, %v1609_v45  ;;  %v1776_v13 = vmul.f32 %v1651_v61, %v1651_v61 }
 0x27b   :  { %4235 = vrcp.f32 %v1556_v32  ;;  %v1614_v12 = vmul.f32 1.442695, %v1608_v6 }
 0x27c   :  { %4237 = vpow2.f32 %v1612_v54 }
 0x27d   :  { %4239 = vpow2.f32 %v1610_v55 }
 0x27e   :  { %4241 = vpow2.f32 %v1616_v62 }
 0x27f   :  { %4243 = vpow2.f32 %v1614_v12 }
 0x280   :  { %v4230_v31 = vpop.eup %4229 }
 0x281   :  { %v4232_v33 = vpop.eup %4231  ;;  %v1567_v29 = vmul.f32 1.0614054, %v4230_v31 }
 0x282   :  { %v1566_v21 = vmul.f32 1.0614054, %v4232_v33 }
 0x283   :  { %v1571_v7 = vadd.f32 -1.4531521, %v1567_v29 }
 0x284   :  { %v4234_v1 = vpop.eup %4233  ;;  %v1570_v36 = vadd.f32 -1.4531521, %v1566_v21 }
 0x285   :  { %v4236_v40 = vpop.eup %4235  ;;  %v1575_v44 = vmul.f32 %v4230_v31, %v1571_v7  ;;  %v1569_v49 = vmul.f32 1.0614054, %v4234_v1 }
 0x286   :  { %v1574_v23 = vmul.f32 %v4232_v33, %v1570_v36  ;;  %v1568_v19 = vmul.f32 1.0614054, %v4236_v40  ;;  %v4238_v37 = vpop.eup %4237 }
 0x287   :  { %v1579_v15 = vadd.f32 1.4214138, %v1575_v44  ;;  %v1573_v3 = vadd.f32 -1.4531521, %v1569_v49  ;;  %v4240_v7 = vpop.eup %4239 }
 0x288   :  { %v1578_v52 = vadd.f32 1.4214138, %v1574_v23  ;;  %v1572_v2 = vadd.f32 -1.4531521, %v1568_v19  ;;  %v4242_v6 = vpop.eup %4241 }
 0x289   :  { %v1583_v5 = vmul.f32 %v4230_v31, %v1579_v15  ;;  %v1577_v43 = vmul.f32 %v4234_v1, %v1573_v3  ;;  %v4244_v15 = vpop.eup %4243 }
 0x28a   :  { %v1582_v17 = vmul.f32 %v4232_v33, %v1578_v52  ;;  %v1576_v10 = vmul.f32 %v4236_v40, %v1572_v2 }
 0x28b   :  { %v1587_v30 = vadd.f32 -0.28449672, %v1583_v5  ;;  %v1581_v25 = vadd.f32 1.4214138, %v1577_v43 }
 0x28c   :  { %v1586_v50 = vadd.f32 -0.28449672, %v1582_v17  ;;  %v1580_v27 = vadd.f32 1.4214138, %v1576_v10  ;;  %v1638_v17 = vmul.f32 0.5, %v5397_v14  ;;  %v1641_v14 = vmul.f32 0.5, %v5406_v24 }
 0x28d   :  { %v1591_v42 = vmul.f32 %v4230_v31, %v1587_v30  ;;  %v1585_v35 = vmul.f32 %v4234_v1, %v1581_v25  ;;  %v1652_v24 = vadd.f32 1.0, %v5193_v51 }
 0x28e   :  { %v1590_v8 = vmul.f32 %v4232_v33, %v1586_v50  ;;  %v1584_v48 = vmul.f32 %v4236_v40, %v1580_v27 }
 0x28f   :  { %v1595_v32 = vadd.f32 0.2548296, %v1591_v42  ;;  %v1589_v22 = vadd.f32 -0.28449672, %v1585_v35  ;;  %v1640_v42 = vmul.f32 0.5, %v5409_v47  ;;  %v1650_v47 = vadd.f32 1.0, %v5179_v41 }
 0x290   :  { %v1594_v58 = vadd.f32 0.2548296, %v1590_v8  ;;  %v1588_v9 = vadd.f32 -0.28449672, %v1584_v48  ;;  %v1653_v48 = vadd.f32 1.0, %v5201_v56 }
 0x291   :  { %v1599_v53 = vmul.f32 %v4230_v31, %v1595_v32  ;;  %v1593_v29 = vmul.f32 %v4234_v1, %v1589_v22  ;;  %v1775_v32 = vmul.f32 %v1650_v47, %v1650_v47  ;;  %v3125_v22 = vld [vmem:[%s5862_s3 + $0xb] ss:$0 sm:$0xff] }
 0x292   :  { %v1598_v16 = vmul.f32 %v4232_v33, %v1594_v58  ;;  %v1592_v21 = vmul.f32 %v4236_v40, %v1588_v9  ;;  %v1784_v58 = vmul.f32 %v3125_v22, %v1776_v13  ;;  %v1778_v9 = vmul.f32 %v1653_v48, %v1653_v48  ;;  %v5962_v13 = vld [vmem:[#allocation12_spill] sm:$0xff] }
 0x293   :  { %v1619_v54 = vmul.f32 %v4238_v37, %v1599_v53  ;;  %v1597_v36 = vadd.f32 0.2548296, %v1593_v29  ;;  %v1783_v53 = vmul.f32 %v3125_v22, %v1775_v32  ;;  %v1777_v29 = vmul.f32 %v1652_v24, %v1652_v24  ;;  %v5964_v32 = vld [vmem:[#allocation16_spill] sm:$0xff] }
 0x294   :  { %v1618_v45 = vmul.f32 %v4240_v7, %v1598_v16  ;;  %v1596_v44 = vadd.f32 0.2548296, %v1592_v21  ;;  %v1788_v37 = vadd.f32 1e-06, %v1784_v58  ;;  %v1809_v58 = vld [vmem:[%s5864_s2 + $0x88] sm:$0xff] }
 0x295   :  { %v1623_v55 = vsub.f32 1.0, %v1619_v54  ;;  %v1601_v49 = vmul.f32 %v4234_v1, %v1597_v36  ;;  %v1787_v16 = vadd.f32 1e-06, %v1783_v53  ;;  %v1785_v46 = vmul.f32 %v3125_v22, %v1777_v29  ;;  %v1810_v53 = vld [vmem:[%s5864_s2 + $0x90] sm:$0xff]  ;;  %v1811_v29 = vld [vmem:[%s5864_s2 + $0x98] sm:$0xff] }
 0x296   :  { %v1622_v23 = vsub.f32 1.0, %v1618_v45  ;;  %v1600_v19 = vmul.f32 %v4236_v40, %v1596_v44  ;;  %v1639_v40 = vmul.f32 0.5, %v5395_v11  ;;  %4245 = vrsqrt.f32 %v1788_v37 }
 0x297   :  { %v1631_v3 = vsub.f32 0.0, %v1623_v55  ;;  %v1621_v52 = vmul.f32 %v4242_v6, %v1601_v49  ;;  %4247 = vrsqrt.f32 %v1787_v16  ;;  %v1789_v21 = vadd.f32 1e-06, %v1785_v46  ;;  %v1813_v16 = vld [vmem:[%s5864_s2 + $0xa8] sm:$0xff] }
 0x298   :  { %v1630_v31 = vsub.f32 0.0, %v1622_v23  ;;  %v1620_v62 = vmul.f32 %v4244_v15, %v1600_v19  ;;  %v4095_v37 = vpack.c.bf16 %v1811_v29, %v1810_v53 }
 0x299   :  { %v1635_v2 = vsel %vm1627_vm5, %v1623_v55, %v1631_v3  ;;  %v1625_v33 = vsub.f32 1.0, %v1621_v52 }
 0x29a   :  { %v1643_v5 = vadd.f32 1.0, %v1635_v2  ;;  %v1634_v43 = vsel %vm1626_vm6, %v1622_v23, %v1630_v31  ;;  %v1624_v12 = vsub.f32 1.0, %v1620_v62 }
 0x29b   :  { %v1642_v1 = vadd.f32 1.0, %v1634_v43  ;;  %v1633_v10 = vsub.f32 0.0, %v1625_v33  ;;  %v5943_v43 = vld [vmem:[#allocation10_spill] sm:$0xff] }
 0x29c   :  { %v1632_v30 = vsub.f32 0.0, %v1624_v12  ;;  %v1647_v50 = vmul.f32 %v1643_v5, %v1639_v40  ;;  %v5942_v5 = vld [vmem:[#allocation9_spill] sm:$0xff] }
 0x29d   :  { %v1646_v25 = vmul.f32 %v1642_v1, %v1638_v17  ;;  %v1637_v39 = vsel %vm1629_vm7, %v1625_v33, %v1633_v10  ;;  %v5941_v33 = vld [vmem:[#allocation6_spill] sm:$0xff]  ;;  %v5951_v1 = vld [vmem:[#allocation23_spill] sm:$0xff]  ;;  %v5952_v10 = vld [vmem:[#allocation24_spill] sm:$0xff] }
 0x29e   :  { %v1645_v27 = vadd.f32 1.0, %v1637_v39  ;;  %v1636_v34 = vsel %vm1628_vm8, %v1624_v12, %v1632_v30  ;;  %v5949_v12 = vld [vmem:[#allocation21_spill] sm:$0xff]  ;;  %v5950_v17 = vld [vmem:[#allocation22_spill] sm:$0xff]  ;;  %v4302_v39 = vld [vmem:[%s5863_s4 + $0xa8] sm:$0xff] }
 0x29f   :  { %v1644_v35 = vadd.f32 1.0, %v1636_v34  ;;  %3661 = vmatprep.mubr.msk.f32.mxu0 %vm1392_vm3, %v1646_v25  ;;  %v5953_v40 = vld [vmem:[#allocation25_spill] sm:$0xff]  ;;  %v5954_v30 = vld [vmem:[#allocation26_spill] sm:$0xff] }
 0x2a0   :  { %3662 = vmatmul.mubr.msk.f32.vlgmr.msra.gmra.mrb[40].mxu0 %vm1392_vm3, %v1647_v50  ;;  %v1649_v8 = vmul.f32 %v1645_v27, %v1641_v14  ;;  %v4246_v56 = vpop.eup %4245  ;;  %v4301_v25 = vld [vmem:[%s5863_s4 + $0xa0] sm:$0xff]  ;;  %v4303_v50 = vld [vmem:[%s5863_s4 + $0xb0] sm:$0xff]  ;;  %v4304_v27 = vld [vmem:[%s5863_s4 + $0xb8] sm:$0xff] }
 0x2a1   :  { %v1648_v11 = vmul.f32 %v1644_v35, %v1640_v42  ;;  %v4248_v51 = vpop.eup %4247  ;;  %v1796_v7 = vmul.f32 %v4246_v56, %v1651_v61  ;;  %v4305_v34 = vld [vmem:[%s5863_s4 + $0xc0] sm:$0xff]  ;;  %v5956_v35 = vld [vmem:[#allocation3_spill] sm:$0xff]  ;;  %v5957_v14 = vld [vmem:[#allocation4_spill] sm:$0xff] }
 0x2a2   :  { %v1795_v45 = vmul.f32 %v4248_v51, %v1650_v47  ;;  %v5955_v42 = vld [vmem:[#allocation2_spill] sm:$0xff]  ;;  %v5960_v61 = vld [vmem:[#allocation8_spill] sm:$0xff]  ;;  %v5961_v47 = vld [vmem:[#allocation11_spill] sm:$0xff] }
 0x2a3   :  { %3664 = vmatprep.mubr.msk.f32.mxu0 %vm1392_vm3, %v1648_v11  ;;  %v5958_v11 = vld [vmem:[#allocation5_spill] sm:$0xff] }
 0x2a4   :  { %3665 = vmatmul.mubr.msk.f32.gmra.mrb[42].mxu0 %vm1392_vm3, %v1649_v8  ;;  %v5959_v8 = vld [vmem:[#allocation7_spill] sm:$0xff] }
 0x2a5   :  { %3675 = vmatprep.mubr.msk.f32.mxu0 %vm898_vm2, %v4905_v57  ;;  %v1786_v57 = vmul.f32 %v3125_v22, %v1778_v9  ;;  %v1808_v22 = vld [vmem:[%s5864_s2 + $0x80] sm:$0xff] }
 0x2a6   :  { %v4089_v9 = vpack.c.bf16 %v1809_v58, %v1808_v22 }
 0x2a7   :  { %v1790_v41 = vadd.f32 1e-06, %v1786_v57  ;;  %v1812_v57 = vld [vmem:[%s5864_s2 + $0xa0] sm:$0xff] }
 0x2a8   :  { %4091 = vmatprep.subr.msk.bf16.mxu1 %vm5139_vm4, %v4089_v9  ;;  %v4101_v46 = vpack.c.bf16 %v1813_v16, %v1812_v57 }
 0x2a9   :  { %4249 = vrsqrt.f32 %v1790_v41  ;;  %4094 = vmatpush3.bf16.xpose.msk.msra.mxu1 %vm5139_vm4, %v4089_v9  ;;  %v1814_v41 = vld [vmem:[%s5864_s2 + $0xb0] sm:$0xff] }
 0x2aa   :  { %4251 = vrsqrt.f32 %v1789_v21  ;;  %4097 = vmatprep.subr.msk.bf16.mxu1 %vm5139_vm4, %v4095_v37  ;;  %v1815_v21 = vld [vmem:[%s5864_s2 + $0xb8] sm:$0xff] }
 0x2ab   :  { %v4107_v56 = vpack.c.bf16 %v1815_v21, %v1814_v41 }
 0x2b1   :  { %4100 = vmatpush3.bf16.xpose.msk.msra.mxu1 %vm5139_vm4, %v4095_v37 }
 0x2b2   :  { %4103 = vmatprep.subr.msk.bf16.mxu1 %vm5139_vm4, %v4101_v46 }
 0x2b3   :  { %v4250_v54 = vpop.eup %4249 }
 0x2b4   :  { %v4252_v44 = vpop.eup %4251  ;;  %v1798_v23 = vmul.f32 %v4250_v54, %v1653_v48  ;;  %v5963_v48 = vld [vmem:[#allocation15_spill] sm:$0xff]  ;;  %v5563_v54 = vld [vmem:[%s5862_s3 + $0x10] sm:$0xff] }
 0x2b5   :  { %v1797_v3 = vmul.f32 %v4252_v44, %v1652_v24  ;;  %v5965_v24 = vld [vmem:[#allocation19_spill] sm:$0xff]  ;;  %v2116_v53 = vrot.slane %v5563_v54, %v1298_v26 }
 0x2b9   :  { %4106 = vmatpush3.bf16.xpose.msk.msra.mxu1 %vm5139_vm4, %v4101_v46 }
 0x2ba   :  { %4109 = vmatprep.subr.msk.bf16.mxu1 %vm5139_vm4, %v4107_v56 }
 0x2c1   :  { %4112 = vmatpush3.bf16.xpose.msk.msra.mxu1 %vm5139_vm4, %v4107_v56 }
 0x373   :  { %v3663_v36 = vpop.f32.mrb[40].mxu0 }
 0x374   :  { %v1800_v55 = vmul.f32 %v3663_v36, %v1796_v7  ;;  %v1756_v49 = vpop.f32.mrb[41].mxu0 }
 0x375   :  { %v1799_v6 = vmul.f32 %v1795_v45, %v1756_v49  ;;  %v5966_v45 = vsub.s32 0, %v5233_v38  ;;  %v5967_v49 = vsub.s32 1, %v5233_v38 }
 0x377   :  { %v4081_v19 = vpack.c.bf16 %v1800_v55, %v1799_v6  ;;  %v3666_v15 = vpop.f32.mrb[42].mxu0  ;;  %v2072_v44 = vrot.slane %v5563_v54, %v5966_v45  ;;  %v2080_v6 = vrot.slane %v5563_v54, %v5967_v49 }
 0x378   :  { %v1802_v52 = vmul.f32 %v3666_v15, %v1798_v23  ;;  %v1766_v31 = vpop.f32.mrb[43].mxu0 }
 0x379   :  { %v1801_v62 = vmul.f32 %v1797_v3, %v1766_v31  ;;  %4082 = vmatprep.subr.bf16.mxu0 %v4081_v19 }
 0x37a   :  { %4084 = vmatpush3.bf16.msra.mxu0 %v4081_v19 }
 0x37b   :  { %v4085_v2 = vpack.c.bf16 %v1802_v52, %v1801_v62 }
 0x37d   :  { %4086 = vmatprep.subr.bf16.mxu0 %v4085_v2 }
 0x37e   :  { %4088 = vmatpush3.bf16.msra.mxu0 %v4085_v2 }
 0x381   :  { %3676 = vmatmul.mubr.msk.f32.vlgmr.msra.gmra.mrb[44].mxu0 %vm898_vm2, %v4922_v59  ;;  %v5944_v59 = vld [vmem:[#allocation13_spill] sm:$0xff] }
 0x382   :  { %3678 = vmatprep.mubr.msk.f32.mxu0 %vm898_vm2, %v4927_v60  ;;  %v5945_v60 = vld [vmem:[#allocation14_spill] sm:$0xff] }
 0x385   :  { %3679 = vmatmul.mubr.msk.f32.gmra.mrb[46].mxu0 %vm898_vm2, %v4948_v63  ;;  %v5946_v63 = vld [vmem:[#allocation17_spill] sm:$0xff] }
 0x386   :  { %3681 = vmatprep.mubr.msk.f32.mxu0 %vm898_vm2, %v4953_v0  ;;  %v5947_v0 = vld [vmem:[#allocation18_spill] sm:$0xff] }
 0x389   :  { %3682 = vmatmul.mubr.msk.f32.gmra.mrb[48].mxu0 %vm898_vm2, %v4976_v4  ;;  %v5948_v4 = vld [vmem:[#allocation20_spill] sm:$0xff] }
 0x38a   :  { %3684 = vmatprep.mubr.msk.f32.mxu0 %vm898_vm2, %v5941_v33 }
 0x38d   :  { %3685 = vmatmul.mubr.msk.f32.gmra.mrb[50].mxu0 %vm898_vm2, %v5942_v5 }
 0x38e   :  { %3687 = vmatprep.mubr.msk.f32.mxu0 %vm898_vm2, %v5943_v43 }
 0x391   :  { %3688 = vmatmul.mubr.msk.f32.gmra.mrb[52].mxu0 %vm898_vm2, %v5944_v59 }
 0x392   :  { %3690 = vmatprep.mubr.msk.f32.mxu0 %vm898_vm2, %v5945_v60  ;;  %v5968_v60 = vsub.s32 2, %v5233_v38 }
 0x395   :  { %3691 = vmatmul.mubr.msk.f32.gmra.mrb[54].mxu0 %vm898_vm2, %v5946_v63  ;;  %v2092_v63 = vrot.slane %v5563_v54, %v5968_v60 }
 0x396   :  { %3693 = vmatprep.mubr.msk.f32.mxu0 %vm898_vm2, %v5947_v0 }
 0x399   :  { %3694 = vmatmul.mubr.msk.f32.gmra.mrb[56].mxu0 %vm898_vm2, %v5948_v4 }
 0x39a   :  { %3696 = vmatprep.mubr.msk.f32.mxu0 %vm898_vm2, %v5949_v12 }
 0x39d   :  { %3697 = vmatmul.mubr.msk.f32.gmra.mrb[58].mxu0 %vm898_vm2, %v5950_v17 }
 0x39e   :  { %3699 = vmatprep.mubr.msk.f32.mxu0 %vm898_vm2, %v5951_v1 }
 0x3a1   :  { %3700 = vmatmul.mubr.msk.f32.gmra.mrb[60].mxu0 %vm898_vm2, %v5952_v10 }
 0x3a2   :  { %3702 = vmatprep.mubr.msk.f32.mxu0 %vm898_vm2, %v5953_v40 }
 0x3a5   :  { %3703 = vmatmul.mubr.msk.f32.gmra.mrb[62].mxu0 %vm898_vm2, %v5954_v30 }
 0x3a6   :  { %3705 = vmatprep.mubr.msk.f32.mxu0 %vm898_vm2, %v4301_v25 }
 0x3a9   :  { %3706 = vmatmul.mubr.msk.f32.gmra.mrb[64].mxu0 %vm898_vm2, %v4302_v39 }
 0x3aa   :  { %3708 = vmatprep.mubr.msk.f32.mxu0 %vm898_vm2, %v4303_v50 }
 0x3ad   :  { %3709 = vmatmul.mubr.msk.f32.gmra.mrb[66].mxu0 %vm898_vm2, %v4304_v27 }
 0x3ae   :  { %3711 = vmatprep.mubr.msk.f32.mxu0 %vm898_vm2, %v4305_v34 }
 0x3b1   :  { %3712 = vmatmul.mubr.msk.f32.gmra.mrb[68].mxu0 %vm898_vm2, %v5955_v42  ;;  %v5969_v42 = vsub.s32 3, %v5233_v38 }
 0x3b2   :  { %3714 = vmatprep.mubr.msk.f32.mxu0 %vm898_vm2, %v5956_v35 }
 0x3b3   :  { %v2104_v35 = vrot.slane %v5563_v54, %v5969_v42 }
 0x3b5   :  { %3715 = vmatmul.mubr.msk.f32.gmra.mrb[70].mxu0 %vm898_vm2, %v5957_v14 }
 0x3b6   :  { %3717 = vmatprep.mubr.msk.f32.mxu0 %vm898_vm2, %v5958_v11 }
 0x3b9   :  { %3718 = vmatmul.mubr.msk.f32.gmra.mrb[72].mxu0 %vm898_vm2, %v5959_v8 }
 0x3ba   :  { %3720 = vmatprep.mubr.msk.f32.mxu0 %vm898_vm2, %v5960_v61 }
 0x3bd   :  { %3721 = vmatmul.mubr.msk.f32.gmra.mrb[74].mxu0 %vm898_vm2, %v5961_v47 }
 0x3be   :  { %3723 = vmatprep.mubr.msk.f32.mxu0 %vm898_vm2, %v5962_v13 }
 0x3c1   :  { %3724 = vmatmul.mubr.msk.f32.gmra.mrb[76].mxu0 %vm898_vm2, %v5963_v48 }
 0x3c2   :  { %3726 = vmatprep.mubr.msk.f32.mxu0 %vm898_vm2, %v5964_v32 }
 0x3c5   :  { %3727 = vmatmul.mubr.msk.f32.gmra.mrb[78].mxu0 %vm898_vm2, %v5965_v24 }
 0x454   :  { %v3677_v51 = vpop.f32.mrb[44].mxu0 }
 0x455   :  { %v1890_v7 = vpop.f32.mrb[45].mxu0  ;;  %v2074_v19 = vmul.f32 %v3677_v51, %v2072_v44 }
 0x456   :  { %v2073_v52 = vmul.f32 %v2072_v44, %v1890_v7 }
 0x458   :  { %v3680_v36 = vpop.f32.mrb[46].mxu0 }
 0x459   :  { %v1900_v55 = vpop.f32.mrb[47].mxu0  ;;  %v2076_v5 = vmul.f32 %v3680_v36, %v2072_v44 }
 0x45a   :  { %v2075_v0 = vmul.f32 %v2072_v44, %v1900_v55  ;;  %v2128_v44 = vrot.slane %v5563_v54, %v1310_v20  ;;  %v5970_v55 = vld [vmem:[#allocation28_spill] sm:$0xff] }
 0x45b   :  { %v5584_v49 = vadd.f32 1.0, %v5970_v55 }
 0x45c   :  { %v3683_v23 = vpop.f32.mrb[48].mxu0 }
 0x45d   :  { %v2082_v15 = vmul.f32 %v3683_v23, %v2080_v6  ;;  %v1910_v3 = vpop.f32.mrb[49].mxu0 }
 0x45e   :  { %v2081_v31 = vmul.f32 %v2080_v6, %v1910_v3 }
 0x45f   :  { %v2086_v62 = vadd.f32 %v2082_v15, %v2074_v19 }
 0x460   :  { %v2085_v2 = vadd.f32 %v2081_v31, %v2073_v52  ;;  %v3686_v33 = vpop.f32.mrb[50].mxu0 }
 0x461   :  { %v2084_v43 = vmul.f32 %v3686_v33, %v2080_v6  ;;  %v1920_v59 = vpop.f32.mrb[51].mxu0 }
 0x462   :  { %v2083_v4 = vmul.f32 %v2080_v6, %v1920_v59  ;;  %v5971_v6 = vld [vmem:[#allocation27_spill] sm:$0xff] }
 0x463   :  { %v2088_v12 = vadd.f32 %v2084_v43, %v2076_v5  ;;  %v5587_v23 = vadd.f32 1.0, %v5971_v6  ;;  %v5973_v43 = vld [vmem:[#allocation29_spill] sm:$0xff] }
 0x464   :  { %v2087_v17 = vadd.f32 %v2083_v4, %v2075_v0  ;;  %v3689_v1 = vpop.f32.mrb[52].mxu0  ;;  %v5597_v59 = vadd.f32 1.0, %v5973_v43 }
 0x465   :  { %v2094_v10 = vmul.f32 %v3689_v1, %v2092_v63  ;;  %v1930_v40 = vpop.f32.mrb[53].mxu0  ;;  %v2177_v20 = vmul.f32 %v5587_v23, %v5587_v23  ;;  %v2140_v1 = vrot.slane %v5563_v54, %v1322_v18 }
 0x466   :  { %v2093_v30 = vmul.f32 %v2092_v63, %v1930_v40 }
 0x467   :  { %v2098_v25 = vadd.f32 %v2094_v10, %v2086_v62  ;;  %v2178_v62 = vmul.f32 %v5584_v49, %v5584_v49 }
 0x468   :  { %v2097_v39 = vadd.f32 %v2093_v30, %v2085_v2  ;;  %v3692_v50 = vpop.f32.mrb[54].mxu0  ;;  %v5972_v2 = vld [vmem:[#allocation30_spill] sm:$0xff] }
 0x469   :  { %v2096_v27 = vmul.f32 %v3692_v50, %v2092_v63  ;;  %v1940_v34 = vpop.f32.mrb[55].mxu0  ;;  %v5592_v33 = vadd.f32 1.0, %v5972_v2 }
 0x46a   :  { %v2095_v14 = vmul.f32 %v2092_v63, %v1940_v34  ;;  %v3163_v63 = vld [vmem:[%s5862_s3 + $0x19] ss:$0 sm:$0xff] }
 0x46b   :  { %v2100_v11 = vadd.f32 %v2096_v27, %v2088_v12  ;;  %v2186_v10 = vmul.f32 %v3163_v63, %v2178_v62  ;;  %v2180_v40 = vmul.f32 %v5592_v33, %v5592_v33 }
 0x46c   :  { %v2099_v8 = vadd.f32 %v2095_v14, %v2087_v17  ;;  %v3695_v61 = vpop.f32.mrb[56].mxu0 }
 0x46d   :  { %v2106_v47 = vmul.f32 %v3695_v61, %v2104_v35  ;;  %v1950_v13 = vpop.f32.mrb[57].mxu0  ;;  %v2190_v14 = vadd.f32 1e-06, %v2186_v10 }
 0x46e   :  { %v2105_v48 = vmul.f32 %v2104_v35, %v1950_v13 }
 0x46f   :  { %v2110_v32 = vadd.f32 %v2106_v47, %v2098_v25  ;;  %v2185_v25 = vmul.f32 %v3163_v63, %v2177_v20  ;;  %4253 = vrsqrt.f32 %v2190_v14  ;;  %v1822_v14 = vld [vmem:[%s5864_s2 + $0xf0] sm:$0xff] }
 0x470   :  { %v2109_v24 = vadd.f32 %v2105_v48, %v2097_v39  ;;  %v3698_v22 = vpop.f32.mrb[58].mxu0  ;;  %v2179_v39 = vmul.f32 %v5597_v59, %v5597_v59 }
 0x471   :  { %v2108_v58 = vmul.f32 %v3698_v22, %v2104_v35  ;;  %v1960_v9 = vpop.f32.mrb[59].mxu0  ;;  %v2189_v61 = vadd.f32 1e-06, %v2185_v25  ;;  %v5974_v22 = vsub.s32 7, %v5233_v38  ;;  %v1816_v25 = vld [vmem:[%s5864_s2 + $0xc0] sm:$0xff] }
 0x472   :  { %v2107_v29 = vmul.f32 %v2104_v35, %v1960_v9  ;;  %v2187_v47 = vmul.f32 %v3163_v63, %v2179_v39  ;;  %v1818_v39 = vld [vmem:[%s5864_s2 + $0xd0] sm:$0xff] }
 0x473   :  { %v2112_v37 = vadd.f32 %v2108_v58, %v2100_v11  ;;  %v2188_v11 = vmul.f32 %v3163_v63, %v2180_v40  ;;  %v2152_v58 = vrot.slane %v5563_v54, %v5974_v22  ;;  %4255 = vrsqrt.f32 %v2189_v61  ;;  %v3162_v54 = vld [vmem:[%s5862_s3 + $0x18] ss:$0 sm:$0xff]  ;;  %v2619_v61 = vld [vmem:[%s5864_s2 + $0x100] sm:$0xff]  ;;  %v2624_v22 = vld [vmem:[%s5864_s2 + $0x128] sm:$0xff] }
 0x474   :  { %v2111_v57 = vadd.f32 %v2107_v29, %v2099_v8  ;;  %v3701_v16 = vpop.f32.mrb[60].mxu0  ;;  %v2191_v29 = vadd.f32 1e-06, %v2187_v47  ;;  %v2620_v47 = vld [vmem:[%s5864_s2 + $0x108] sm:$0xff] }
 0x475   :  { %v2118_v46 = vmul.f32 %v3701_v16, %v2116_v53  ;;  %v1970_v41 = vpop.f32.mrb[61].mxu0  ;;  %v2192_v9 = vadd.f32 1e-06, %v2188_v11  ;;  %v1823_v11 = vld [vmem:[%s5864_s2 + $0xf8] sm:$0xff] }
 0x476   :  { %v2117_v21 = vmul.f32 %v2116_v53, %v1970_v41 }
 0x477   :  { %v2122_v56 = vadd.f32 %v2118_v46, %v2110_v32  ;;  %4257 = vrsqrt.f32 %v2192_v9  ;;  %v2625_v9 = vld [vmem:[%s5864_s2 + $0x130] sm:$0xff] }
 0x478   :  { %v2121_v51 = vadd.f32 %v2117_v21, %v2109_v24  ;;  %v3704_v7 = vpop.f32.mrb[62].mxu0  ;;  %4259 = vrsqrt.f32 %v2191_v29 }
 0x479   :  { %v2120_v36 = vmul.f32 %v3704_v7, %v2116_v53  ;;  %v1980_v45 = vpop.f32.mrb[63].mxu0  ;;  %v4254_v55 = vpop.eup %4253 }
 0x47a   :  { %v2119_v26 = vmul.f32 %v2116_v53, %v1980_v45 }
 0x47b   :  { %v2124_v19 = vadd.f32 %v2120_v36, %v2112_v37 }
 0x47c   :  { %v2123_v15 = vadd.f32 %v2119_v26, %v2111_v57  ;;  %v3707_v3 = vpop.f32.mrb[64].mxu0 }
 0x47d   :  { %v2130_v52 = vmul.f32 %v3707_v3, %v2128_v44  ;;  %v1990_v31 = vpop.f32.mrb[65].mxu0 }
 0x47e   :  { %v2129_v5 = vmul.f32 %v2128_v44, %v1990_v31  ;;  %v2198_v31 = vmul.f32 %v4254_v55, %v5584_v49 }
 0x47f   :  { %v2134_v60 = vadd.f32 %v2130_v52, %v2122_v56 }
 0x480   :  { %v2133_v0 = vadd.f32 %v2129_v5, %v2121_v51  ;;  %v3710_v4 = vpop.f32.mrb[66].mxu0 }
 0x481   :  { %v2132_v12 = vmul.f32 %v3710_v4, %v2128_v44  ;;  %v2000_v17 = vpop.f32.mrb[67].mxu0 }
 0x482   :  { %v2131_v30 = vmul.f32 %v2128_v44, %v2000_v17 }
 0x483   :  { %v2136_v50 = vadd.f32 %v2132_v12, %v2124_v19  ;;  %v4256_v19 = vpop.eup %4255 }
 0x484   :  { %v2135_v27 = vadd.f32 %v2131_v30, %v2123_v15  ;;  %v3713_v34 = vpop.f32.mrb[68].mxu0  ;;  %v4258_v2 = vpop.eup %4257  ;;  %v2197_v5 = vmul.f32 %v4256_v19, %v5587_v23 }
 0x485   :  { %v2142_v42 = vmul.f32 %v3713_v34, %v2140_v1  ;;  %v2010_v35 = vpop.f32.mrb[69].mxu0  ;;  %v1820_v34 = vld [vmem:[%s5864_s2 + $0xe0] sm:$0xff] }
 0x486   :  { %v2141_v8 = vmul.f32 %v2140_v1, %v2010_v35 }
 0x487   :  { %v2146_v18 = vadd.f32 %v2142_v42, %v2134_v60  ;;  %v4260_v60 = vpop.eup %4259  ;;  %v1821_v42 = vld [vmem:[%s5864_s2 + $0xe8] sm:$0xff] }
 0x488   :  { %v2145_v13 = vadd.f32 %v2141_v8, %v2133_v0  ;;  %v3716_v48 = vpop.f32.mrb[70].mxu0  ;;  %v2199_v40 = vmul.f32 %v4260_v60, %v5597_v59  ;;  %v4125_v35 = vpack.c.bf16 %v1821_v42, %v1820_v34  ;;  %v4131_v8 = vpack.c.bf16 %v1823_v11, %v1822_v14 }
 0x489   :  { %v2144_v32 = vmul.f32 %v3716_v48, %v2140_v1  ;;  %v2020_v24 = vpop.f32.mrb[71].mxu0  ;;  %v2622_v48 = vld [vmem:[%s5864_s2 + $0x118] sm:$0xff] }
 0x48a   :  { %v2143_v53 = vmul.f32 %v2140_v1, %v2020_v24  ;;  %v2200_v1 = vmul.f32 %v4258_v2, %v5592_v33  ;;  %v1817_v33 = vld [vmem:[%s5864_s2 + $0xc8] sm:$0xff]  ;;  %v2623_v24 = vld [vmem:[%s5864_s2 + $0x120] sm:$0xff] }
 0x48b   :  { %v2148_v37 = vadd.f32 %v2144_v32, %v2136_v50  ;;  %v4113_v59 = vpack.c.bf16 %v1817_v33, %v1816_v25  ;;  %v1819_v50 = vld [vmem:[%s5864_s2 + $0xd8] sm:$0xff] }
 0x48c   :  { %v2147_v57 = vadd.f32 %v2143_v53, %v2135_v27  ;;  %v3719_v16 = vpop.f32.mrb[72].mxu0  ;;  %v4119_v27 = vpack.c.bf16 %v1819_v50, %v1818_v39  ;;  %v2626_v53 = vld [vmem:[%s5864_s2 + $0x138] sm:$0xff] }
 0x48d   :  { %v2154_v46 = vmul.f32 %v3719_v16, %v2152_v58  ;;  %v2030_v41 = vpop.f32.mrb[73].mxu0  ;;  %4115 = vmatprep.subr.msk.bf16.mxu1 %vm5139_vm4, %v4113_v59  ;;  %v4155_v29 = vpack.c.bf16 %v2626_v53, %v2625_v9  ;;  %v5976_v16 = vld [vmem:[#allocation31_spill] sm:$0xff] }
 0x48e   :  { %v2153_v21 = vmul.f32 %v2152_v58, %v2030_v41 }
 0x48f   :  { %v2158_v56 = vadd.f32 %v2154_v46, %v2146_v18  ;;  %v2621_v18 = vld [vmem:[%s5864_s2 + $0x110] sm:$0xff]  ;;  %v2205_v46 = vadd.f32 1.0, %v5976_v16 }
 0x490   :  { %v2157_v51 = vadd.f32 %v2153_v21, %v2145_v13  ;;  %v3722_v7 = vpop.f32.mrb[74].mxu0  ;;  %v4137_v13 = vpack.c.bf16 %v2620_v47, %v2619_v61  ;;  %v4143_v32 = vpack.c.bf16 %v2622_v48, %v2621_v18  ;;  %v5977_v21 = vld [vmem:[#allocation41_spill] sm:$0xff] }
 0x491   :  { %v2156_v36 = vmul.f32 %v3722_v7, %v2152_v58  ;;  %v2040_v38 = vpop.f32.mrb[75].mxu0  ;;  %v5978_v7 = vld [vmem:[#allocation39_spill] sm:$0xff] }
 0x492   :  { %v2155_v45 = vmul.f32 %v2152_v58, %v2040_v38  ;;  %4139 = vmatprep.subr.msk.bf16.mxu0 %vm5139_vm4, %v4137_v13  ;;  %v4149_v58 = vpack.c.bf16 %v2624_v22, %v2623_v24  ;;  %v3176_v38 = vld [vmem:[%s5862_s3 + $0x1a] ss:$0 sm:$0xff] }
 0x493   :  { %v2160_v44 = vadd.f32 %v2156_v36, %v2148_v37  ;;  %4142 = vmatpush3.bf16.xpose.msk.msra.mxu0 %vm5139_vm4, %v4137_v13  ;;  %v5975_v37 = vld [vmem:[#allocation35_spill] sm:$0xff]  ;;  %v2207_v36 = vadd.f32 1.0, %v5978_v7 }
 0x494   :  { %v2159_v26 = vadd.f32 %v2155_v45, %v2147_v57  ;;  %v3725_v6 = vpop.f32.mrb[76].mxu0  ;;  %4145 = vmatprep.subr.msk.bf16.mxu0 %vm5139_vm4, %v4143_v32  ;;  %v2206_v57 = vadd.f32 1.0, %v5975_v37 }
 0x495   :  { %v2166_v15 = vmul.f32 %v3725_v6, %v3162_v54  ;;  %v2050_v3 = vpop.f32.mrb[77].mxu0  ;;  %v2332_v55 = vmul.f32 %v2207_v36, %v2207_v36 }
 0x496   :  { %v2165_v52 = vmul.f32 %v3162_v54, %v2050_v3  ;;  %v2331_v41 = vmul.f32 %v2206_v57, %v2206_v57 }
 0x497   :  { %v2170_v62 = vadd.f32 %v2166_v15, %v2158_v56  ;;  %v2208_v56 = vadd.f32 1.0, %v5977_v21  ;;  %v2340_v15 = vmul.f32 %v3176_v38, %v2332_v55 }
 0x498   :  { %v2169_v20 = vadd.f32 %v2165_v52, %v2157_v51  ;;  %v3728_v43 = vpop.f32.mrb[78].mxu0  ;;  %v2330_v51 = vmul.f32 %v2205_v46, %v2205_v46  ;;  %v2339_v45 = vmul.f32 %v3176_v38, %v2331_v41 }
 0x499   :  { %v2202_v63 = vmul.f32 %v2198_v31, %v2170_v62  ;;  %v2168_v0 = vmul.f32 %v3728_v43, %v3162_v54  ;;  %v2060_v4 = vpop.f32.mrb[79].mxu0  ;;  %v2344_v52 = vadd.f32 1e-06, %v2340_v15 }
 0x49a   :  { %v2201_v12 = vmul.f32 %v2197_v5, %v2169_v20  ;;  %v2167_v17 = vmul.f32 %v3162_v54, %v2060_v4  ;;  %v2333_v54 = vmul.f32 %v2208_v56, %v2208_v56 }
 0x49b   :  { %v2172_v10 = vadd.f32 %v2168_v0, %v2160_v44  ;;  %4148 = vmatpush3.bf16.xpose.msk.msra.mxu0 %vm5139_vm4, %v4143_v32  ;;  %v2338_v44 = vmul.f32 %v3176_v38, %v2330_v51 }
 0x49c   :  { %v2171_v30 = vadd.f32 %v2167_v17, %v2159_v26  ;;  %3745 = vmatprep.mubr.msk.f32.mxu1 %vm1392_vm3, %v2201_v12  ;;  %4151 = vmatprep.subr.msk.bf16.mxu0 %vm5139_vm4, %v4149_v58  ;;  %v2343_v26 = vadd.f32 1e-06, %v2339_v45  ;;  %v2341_v6 = vmul.f32 %v3176_v38, %v2333_v54 }
 0x49d   :  { %v2204_v49 = vmul.f32 %v2200_v1, %v2172_v10  ;;  %3746 = vmatmul.mubr.msk.f32.vlgmr.msra.gmra.mrb[28].mxu1 %vm1392_vm3, %v2202_v63  ;;  %v2342_v19 = vadd.f32 1e-06, %v2338_v44 }
 0x49e   :  { %v2203_v23 = vmul.f32 %v2199_v40, %v2171_v30  ;;  %4118 = vmatpush3.bf16.xpose.msk.msra.mxu1 %vm5139_vm4, %v4113_v59  ;;  %4261 = vrsqrt.f32 %v2343_v26  ;;  %v2345_v3 = vadd.f32 1e-06, %v2341_v6 }
 0x49f   :  { %4121 = vmatprep.subr.msk.bf16.mxu1 %vm5139_vm4, %v4119_v27  ;;  %4263 = vrsqrt.f32 %v2342_v19 }
 0x4a0   :  { %3748 = vmatprep.mubr.msk.f32.mxu1 %vm1392_vm3, %v2203_v23  ;;  %4265 = vrsqrt.f32 %v2345_v3 }
 0x4a1   :  { %3749 = vmatmul.mubr.msk.f32.gmra.mrb[30].mxu1 %vm1392_vm3, %v2204_v49  ;;  %4267 = vrsqrt.f32 %v2344_v52 }
 0x4a3   :  { %4154 = vmatpush3.bf16.xpose.msk.msra.mxu0 %vm5139_vm4, %v4149_v58 }
 0x4a4   :  { %4157 = vmatprep.subr.msk.bf16.mxu0 %vm5139_vm4, %v4155_v29 }
 0x4a6   :  { %4124 = vmatpush3.bf16.xpose.msk.msra.mxu1 %vm5139_vm4, %v4119_v27 }
 0x4a7   :  { %4127 = vmatprep.subr.msk.bf16.mxu1 %vm5139_vm4, %v4125_v35 }
 0x4a8   :  { %v4262_v31 = vpop.eup %4261 }
 0x4a9   :  { %v4264_v62 = vpop.eup %4263  ;;  %v2351_v2 = vmul.f32 %v4262_v31, %v2206_v57 }
 0x4aa   :  { %v4266_v5 = vpop.eup %4265  ;;  %v2350_v43 = vmul.f32 %v4264_v62, %v2205_v46 }
 0x4ab   :  { %4160 = vmatpush3.bf16.xpose.msk.msra.mxu0 %vm5139_vm4, %v4155_v29  ;;  %v4268_v60 = vpop.eup %4267  ;;  %v2353_v17 = vmul.f32 %v4266_v5, %v2208_v56 }
 0x4ac   :  { %v2352_v40 = vmul.f32 %v4268_v60, %v2207_v36 }
 0x4ae   :  { %4130 = vmatpush3.bf16.xpose.msk.msra.mxu1 %vm5139_vm4, %v4125_v35 }
 0x4af   :  { %4133 = vmatprep.subr.msk.bf16.mxu1 %vm5139_vm4, %v4131_v8 }
 0x4b6   :  { %4136 = vmatpush3.bf16.xpose.msk.msra.mxu1 %vm5139_vm4, %v4131_v8 }
 0x570   :  { %v3747_v20 = vpop.f32.mrb[28].mxu1 }
 0x571   :  { %v5710_v63 = vmul.f32 %v3747_v20, %v2351_v2  ;;  %v2311_v0 = vpop.f32.mrb[29].mxu1 }
 0x572   :  { %v5712_v4 = vmul.f32 %v2350_v43, %v2311_v0 }
 0x573   :  { %v5715_v12 = vmul.f32 0.70710677, %v5710_v63 }
 0x574   :  { %v5718_v1 = vmul.f32 0.70710677, %v5712_v4  ;;  %v3750_v10 = vpop.f32.mrb[30].mxu1 }
 0x575   :  { %v2363_v30 = vand.u32 2147483647, %v5715_v12  ;;  %v5721_v49 = vmul.f32 %v3750_v10, %v2353_v17  ;;  %v2321_v23 = vpop.f32.mrb[31].mxu1  ;;  %vm2443_vm9 = vcmp.ge.f32.partialorder %v5715_v12, 0.0 }
 0x576   :  { %v2362_v25 = vand.u32 2147483647, %v5718_v1  ;;  %v5724_v33 = vmul.f32 %v2352_v40, %v2321_v23  ;;  %vm2442_vm10 = vcmp.ge.f32.partialorder %v5718_v1, 0.0 }
 0x577   :  { %v2367_v59 = vmul.f32 0.3275911, %v2363_v30  ;;  %v5727_v39 = vmul.f32 0.70710677, %v5721_v49  ;;  %v2419_v18 = vsub.f32 0.0, %v2363_v30 }
 0x578   :  { %v2366_v50 = vmul.f32 0.3275911, %v2362_v25  ;;  %v5730_v27 = vmul.f32 0.70710677, %v5724_v33  ;;  %v2418_v13 = vsub.f32 0.0, %v2362_v25 }
 0x579   :  { %v2371_v34 = vadd.f32 1.0, %v2367_v59  ;;  %v2365_v42 = vand.u32 2147483647, %v5727_v39  ;;  %v2423_v32 = vmul.f32 %v2419_v18, %v2363_v30  ;;  %vm2445_vm11 = vcmp.ge.f32.partialorder %v5727_v39, 0.0  ;;  %v2627_v39 = vld [vmem:[%s5864_s2 + $0x140] sm:$0xff] }
 0x57a   :  { %v2370_v35 = vadd.f32 1.0, %v2366_v50  ;;  %v2364_v14 = vand.u32 2147483647, %v5730_v27  ;;  %v2422_v9 = vmul.f32 %v2418_v13, %v2362_v25  ;;  %vm2444_vm12 = vcmp.ge.f32.partialorder %v5730_v27, 0.0 }
 0x57b   :  { %4269 = vrcp.f32 %v2371_v34  ;;  %v2369_v11 = vmul.f32 0.3275911, %v2365_v42  ;;  %v2421_v24 = vsub.f32 0.0, %v2365_v42  ;;  %v2428_v16 = vmul.f32 1.442695, %v2423_v32 }
 0x57c   :  { %4271 = vrcp.f32 %v2370_v35  ;;  %v2368_v8 = vmul.f32 0.3275911, %v2364_v14  ;;  %v2420_v53 = vsub.f32 0.0, %v2364_v14  ;;  %v2426_v51 = vmul.f32 1.442695, %v2422_v9 }
 0x57d   :  { %v2373_v61 = vadd.f32 1.0, %v2369_v11  ;;  %v2425_v41 = vmul.f32 %v2421_v24, %v2365_v42 }
 0x57e   :  { %v2372_v47 = vadd.f32 1.0, %v2368_v8  ;;  %v2424_v36 = vmul.f32 %v2420_v53, %v2364_v14 }
 0x57f   :  { %4273 = vrcp.f32 %v2373_v61  ;;  %v2432_v26 = vmul.f32 1.442695, %v2425_v41 }
 0x580   :  { %4275 = vrcp.f32 %v2372_v47  ;;  %v2430_v3 = vmul.f32 1.442695, %v2424_v36 }
 0x581   :  { %4277 = vpow2.f32 %v2428_v16 }
 0x582   :  { %4279 = vpow2.f32 %v2426_v51 }
 0x583   :  { %4281 = vpow2.f32 %v2432_v26  ;;  %v2630_v26 = vld [vmem:[%s5864_s2 + $0x158] sm:$0xff] }
 0x584   :  { %4283 = vpow2.f32 %v2430_v3 }
 0x585   :  { %v4270_v48 = vpop.eup %4269 }
 0x586   :  { %v4272_v22 = vpop.eup %4271  ;;  %v2383_v58 = vmul.f32 1.0614054, %v4270_v48 }
 0x587   :  { %v2382_v29 = vmul.f32 1.0614054, %v4272_v22 }
 0x588   :  { %v2387_v37 = vadd.f32 -1.4531521, %v2383_v58 }
 0x589   :  { %v4274_v57 = vpop.eup %4273  ;;  %v2386_v46 = vadd.f32 -1.4531521, %v2382_v29 }
 0x58a   :  { %v4276_v21 = vpop.eup %4275  ;;  %v2391_v56 = vmul.f32 %v4270_v48, %v2387_v37  ;;  %v2385_v7 = vmul.f32 1.0614054, %v4274_v57 }
 0x58b   :  { %v2390_v38 = vmul.f32 %v4272_v22, %v2386_v46  ;;  %v2384_v45 = vmul.f32 1.0614054, %v4276_v21  ;;  %v4278_v50 = vpop.eup %4277 }
 0x58c   :  { %v2395_v54 = vadd.f32 1.4214138, %v2391_v56  ;;  %v2389_v44 = vadd.f32 -1.4531521, %v2385_v7  ;;  %v4280_v35 = vpop.eup %4279  ;;  %v2454_v56 = vmul.f32 0.5, %v5712_v4  ;;  %v2457_v4 = vmul.f32 0.5, %v5721_v49 }
 0x58d   :  { %v2394_v55 = vadd.f32 1.4214138, %v2390_v38  ;;  %v2388_v6 = vadd.f32 -1.4531521, %v2384_v45  ;;  %v4282_v13 = vpop.eup %4281  ;;  %v2629_v49 = vld [vmem:[%s5864_s2 + $0x150] sm:$0xff] }
 0x58e   :  { %v2399_v19 = vmul.f32 %v4270_v48, %v2395_v54  ;;  %v2393_v15 = vmul.f32 %v4274_v57, %v2389_v44  ;;  %v4284_v58 = vpop.eup %4283  ;;  %v2456_v54 = vmul.f32 0.5, %v5724_v33  ;;  %v2628_v33 = vld [vmem:[%s5864_s2 + $0x148] sm:$0xff] }
 0x58f   :  { %v2398_v52 = vmul.f32 %v4272_v22, %v2394_v55  ;;  %v2392_v31 = vmul.f32 %v4276_v21, %v2388_v6  ;;  %v4161_v27 = vpack.c.bf16 %v2628_v33, %v2627_v39  ;;  %v4167_v6 = vpack.c.bf16 %v2630_v26, %v2629_v49 }
 0x590   :  { %v2403_v62 = vadd.f32 -0.28449672, %v2399_v19  ;;  %v2397_v2 = vadd.f32 1.4214138, %v2393_v15  ;;  %v2631_v19 = vld [vmem:[%s5864_s2 + $0x160] sm:$0xff]  ;;  %v2632_v15 = vld [vmem:[%s5864_s2 + $0x168] sm:$0xff] }
 0x591   :  { %v2402_v5 = vadd.f32 -0.28449672, %v2398_v52  ;;  %v2396_v20 = vadd.f32 1.4214138, %v2392_v31  ;;  %4163 = vmatprep.subr.msk.bf16.mxu1 %vm5139_vm4, %v4161_v27  ;;  %v4173_v3 = vpack.c.bf16 %v2632_v15, %v2631_v19  ;;  %v2633_v52 = vld [vmem:[%s5864_s2 + $0x170] sm:$0xff]  ;;  %v2634_v31 = vld [vmem:[%s5864_s2 + $0x178] sm:$0xff] }
 0x592   :  { %v2407_v43 = vmul.f32 %v4270_v48, %v2403_v62  ;;  %v2401_v60 = vmul.f32 %v4274_v57, %v2397_v2  ;;  %v4179_v62 = vpack.c.bf16 %v2634_v31, %v2633_v52  ;;  %v2635_v2 = vld [vmem:[%s5864_s2 + $0x180] sm:$0xff]  ;;  %v5983_v19 = vld [vmem:[#allocation33_spill] sm:$0xff] }
 0x593   :  { %v2406_v0 = vmul.f32 %v4272_v22, %v2402_v5  ;;  %v2400_v17 = vmul.f32 %v4276_v21, %v2396_v20  ;;  %v2636_v5 = vld [vmem:[%s5864_s2 + $0x188] sm:$0xff]  ;;  %v2915_v15 = vadd.f32 1.0, %v5983_v19 }
 0x594   :  { %v2411_v10 = vadd.f32 0.2548296, %v2407_v43  ;;  %v2405_v40 = vadd.f32 -0.28449672, %v2401_v60  ;;  %v4185_v20 = vpack.c.bf16 %v2636_v5, %v2635_v2  ;;  %v2637_v43 = vld [vmem:[%s5864_s2 + $0x190] sm:$0xff]  ;;  %v2638_v60 = vld [vmem:[%s5864_s2 + $0x198] sm:$0xff] }
 0x595   :  { %v2410_v30 = vadd.f32 0.2548296, %v2406_v0  ;;  %v2404_v23 = vadd.f32 -0.28449672, %v2400_v17  ;;  %v4191_v0 = vpack.c.bf16 %v2638_v60, %v2637_v43  ;;  %v2639_v17 = vld [vmem:[%s5864_s2 + $0x1a0] sm:$0xff] }
 0x596   :  { %v2415_v25 = vmul.f32 %v4270_v48, %v2411_v10  ;;  %v2409_v59 = vmul.f32 %v4274_v57, %v2405_v40  ;;  %v2640_v10 = vld [vmem:[%s5864_s2 + $0x1a8] sm:$0xff]  ;;  %v5986_v60 = vld [vmem:[#allocation38_spill] sm:$0xff] }
 0x597   :  { %v2414_v34 = vmul.f32 %v4272_v22, %v2410_v30  ;;  %v2408_v42 = vmul.f32 %v4276_v21, %v2404_v23  ;;  %v4197_v40 = vpack.c.bf16 %v2640_v10, %v2639_v17  ;;  %v2641_v30 = vld [vmem:[%s5864_s2 + $0x1b0] sm:$0xff]  ;;  %v2642_v23 = vld [vmem:[%s5864_s2 + $0x1b8] sm:$0xff] }
 0x598   :  { %v2435_v14 = vmul.f32 %v4278_v50, %v2415_v25  ;;  %v2413_v11 = vadd.f32 0.2548296, %v2409_v59  ;;  %v4203_v25 = vpack.c.bf16 %v2642_v23, %v2641_v30  ;;  %v5979_v59 = vld [vmem:[#allocation36_spill] sm:$0xff] }
 0x599   :  { %v2434_v8 = vmul.f32 %v4280_v35, %v2414_v34  ;;  %v2412_v61 = vadd.f32 0.2548296, %v2408_v42  ;;  %v2467_v50 = vadd.f32 1.0, %v5979_v59  ;;  %v5980_v34 = vld [vmem:[#allocation32_spill] sm:$0xff] }
 0x59a   :  { %v2439_v47 = vsub.f32 1.0, %v2435_v14  ;;  %v2417_v18 = vmul.f32 %v4274_v57, %v2413_v11  ;;  %v2466_v42 = vadd.f32 1.0, %v5980_v34  ;;  %v5981_v14 = vld [vmem:[#allocation42_spill] sm:$0xff] }
 0x59b   :  { %v2438_v32 = vsub.f32 1.0, %v2434_v8  ;;  %v2416_v24 = vmul.f32 %v4276_v21, %v2412_v61  ;;  %v2455_v21 = vmul.f32 0.5, %v5710_v63  ;;  %v2592_v35 = vmul.f32 %v2467_v50, %v2467_v50  ;;  %v5982_v61 = vld [vmem:[#allocation40_spill] sm:$0xff] }
 0x59c   :  { %v2447_v9 = vsub.f32 0.0, %v2439_v47  ;;  %v2437_v53 = vmul.f32 %v4282_v13, %v2417_v18  ;;  %v2469_v11 = vadd.f32 1.0, %v5981_v14  ;;  %v2591_v8 = vmul.f32 %v2466_v42, %v2466_v42  ;;  %v3189_v18 = vld [vmem:[%s5862_s3 + $0x1b] ss:$0 sm:$0xff] }
 0x59d   :  { %v2446_v48 = vsub.f32 0.0, %v2438_v32  ;;  %v2436_v29 = vmul.f32 %v4284_v58, %v2416_v24  ;;  %v2600_v13 = vmul.f32 %v3189_v18, %v2592_v35 }
 0x59e   :  { %v2451_v37 = vsel %vm2443_vm9, %v2439_v47, %v2447_v9  ;;  %v2441_v22 = vsub.f32 1.0, %v2437_v53  ;;  %v2468_v47 = vadd.f32 1.0, %v5982_v61  ;;  %v2599_v24 = vmul.f32 %v3189_v18, %v2591_v8 }
 0x59f   :  { %v2459_v16 = vadd.f32 1.0, %v2451_v37  ;;  %v2450_v46 = vsel %vm2442_vm10, %v2438_v32, %v2446_v48  ;;  %v2440_v41 = vsub.f32 1.0, %v2436_v29  ;;  %v2594_v32 = vmul.f32 %v2469_v11, %v2469_v11 }
 0x5a0   :  { %v2458_v57 = vadd.f32 1.0, %v2450_v46  ;;  %v2449_v51 = vsub.f32 0.0, %v2441_v22  ;;  %v2593_v58 = vmul.f32 %v2468_v47, %v2468_v47  ;;  %v2604_v28 = vadd.f32 1e-06, %v2600_v13 }
 0x5a1   :  { %v2448_v7 = vsub.f32 0.0, %v2440_v41  ;;  %v2463_v38 = vmul.f32 %v2459_v16, %v2455_v21  ;;  %v2602_v9 = vmul.f32 %v3189_v18, %v2594_v32  ;;  %v2603_v53 = vadd.f32 1e-06, %v2599_v24 }
 0x5a2   :  { %v2462_v36 = vmul.f32 %v2458_v57, %v2454_v56  ;;  %v2453_v12 = vsel %vm2445_vm11, %v2441_v22, %v2449_v51  ;;  %v2601_v48 = vmul.f32 %v3189_v18, %v2593_v58  ;;  %4285 = vrsqrt.f32 %v2604_v28 }
 0x5a3   :  { %v2461_v45 = vadd.f32 1.0, %v2453_v12  ;;  %v2452_v1 = vsel %vm2444_vm12, %v2440_v41, %v2448_v7  ;;  %v2606_v29 = vadd.f32 1e-06, %v2602_v9  ;;  %4287 = vrsqrt.f32 %v2603_v53 }
 0x5a4   :  { %v2460_v44 = vadd.f32 1.0, %v2452_v1  ;;  %3767 = vmatprep.mubr.msk.f32.mxu1 %vm1392_vm3, %v2462_v36  ;;  %v2605_v37 = vadd.f32 1e-06, %v2601_v48 }
 0x5a5   :  { %3768 = vmatmul.mubr.msk.f32.vlgmr.msra.gmra.mrb[32].mxu1 %vm1392_vm3, %v2463_v38  ;;  %v2465_v55 = vmul.f32 %v2461_v45, %v2457_v4  ;;  %4289 = vrsqrt.f32 %v2606_v29  ;;  %v3190_v4 = vld [vmem:[%s5862_s3 + $0x20] ss:$0 sm:$0xff] }
 0x5a6   :  { %v2464_v63 = vmul.f32 %v2460_v44, %v2456_v54  ;;  %4166 = vmatpush3.bf16.xpose.msk.msra.mxu1 %vm5139_vm4, %v4161_v27  ;;  %4291 = vrsqrt.f32 %v2605_v37 }
 0x5a7   :  { %4169 = vmatprep.subr.msk.bf16.mxu1 %vm5139_vm4, %v4167_v6 }
 0x5a8   :  { %3770 = vmatprep.mubr.msk.f32.mxu1 %vm1392_vm3, %v2464_v63 }
 0x5a9   :  { %3771 = vmatmul.mubr.msk.f32.gmra.mrb[34].mxu1 %vm1392_vm3, %v2465_v55 }
 0x5ac   :  { %v4286_v22 = vpop.eup %4285 }
 0x5ad   :  { %v4288_v16 = vpop.eup %4287  ;;  %v2612_v46 = vmul.f32 %v4286_v22, %v2467_v50 }
 0x5ae   :  { %4172 = vmatpush3.bf16.xpose.msk.msra.mxu1 %vm5139_vm4, %v4167_v6  ;;  %v2611_v57 = vmul.f32 %v4288_v16, %v2466_v42 }
 0x5af   :  { %4175 = vmatprep.subr.msk.bf16.mxu1 %vm5139_vm4, %v4173_v3  ;;  %v4290_v41 = vpop.eup %4289 }
 0x5b0   :  { %v4292_v51 = vpop.eup %4291  ;;  %v2614_v12 = vmul.f32 %v4290_v41, %v2469_v11 }
 0x5b1   :  { %v2613_v45 = vmul.f32 %v4292_v51, %v2468_v47 }
 0x5b6   :  { %4178 = vmatpush3.bf16.xpose.msk.msra.mxu1 %vm5139_vm4, %v4173_v3  ;;  %v5984_v3 = vld [vmem:[#allocation34_spill] sm:$0xff] }
 0x5b7   :  { %4181 = vmatprep.subr.msk.bf16.mxu1 %vm5139_vm4, %v4179_v62  ;;  %v2914_v52 = vadd.f32 1.0, %v5984_v3 }
 0x5be   :  { %4184 = vmatpush3.bf16.xpose.msk.msra.mxu1 %vm5139_vm4, %v4179_v62 }
 0x5bf   :  { %4187 = vmatprep.subr.msk.bf16.mxu1 %vm5139_vm4, %v4185_v20 }
 0x5c6   :  { %4190 = vmatpush3.bf16.xpose.msk.msra.mxu1 %vm5139_vm4, %v4185_v20  ;;  %v5985_v20 = vld [vmem:[#allocation37_spill] sm:$0xff] }
 0x5c7   :  { %4193 = vmatprep.subr.msk.bf16.mxu1 %vm5139_vm4, %v4191_v0  ;;  %v2917_v43 = vadd.f32 1.0, %v5985_v20 }
 0x5ce   :  { %4196 = vmatpush3.bf16.xpose.msk.msra.mxu1 %vm5139_vm4, %v4191_v0  ;;  %v2916_v0 = vadd.f32 1.0, %v5986_v60 }
 0x5cf   :  { %4199 = vmatprep.subr.msk.bf16.mxu1 %vm5139_vm4, %v4197_v40 }
 0x5d6   :  { %4202 = vmatpush3.bf16.xpose.msk.msra.mxu1 %vm5139_vm4, %v4197_v40 }
 0x5d7   :  { %4205 = vmatprep.subr.msk.bf16.mxu1 %vm5139_vm4, %v4203_v25 }
 0x5de   :  { %4208 = vmatpush3.bf16.xpose.msk.msra.mxu1 %vm5139_vm4, %v4203_v25 }
 0x678   :  { %v3769_v56 = vpop.f32.mrb[32].mxu1 }
 0x679   :  { %v2616_v21 = vmul.f32 %v3769_v56, %v2612_v46  ;;  %v2572_v7 = vpop.f32.mrb[33].mxu1 }
 0x67a   :  { %v2615_v36 = vmul.f32 %v2611_v57, %v2572_v7 }
 0x67c   :  { %v3772_v38 = vpop.f32.mrb[34].mxu1  ;;  %3789 = vmatprep.mubr.msk.f32.mxu0 %vm1392_vm3, %v2615_v36 }
 0x67d   :  { %v2618_v1 = vmul.f32 %v3772_v38, %v2614_v12  ;;  %v2582_v54 = vpop.f32.mrb[35].mxu1  ;;  %3790 = vmatmul.mubr.msk.f32.vlgmr.msra.gmra.mrb[80].mxu0 %vm1392_vm3, %v2616_v21 }
 0x67e   :  { %v2617_v44 = vmul.f32 %v2613_v45, %v2582_v54 }
 0x680   :  { %3792 = vmatprep.mubr.msk.f32.mxu0 %vm1392_vm3, %v2617_v44 }
 0x681   :  { %3793 = vmatmul.mubr.msk.f32.gmra.mrb[82].mxu0 %vm1392_vm3, %v2618_v1 }
 0x750   :  { %v3791_v63 = vpop.f32.mrb[80].mxu0 }
 0x751   :  { %v2750_v55 = vpop.f32.mrb[81].mxu0  ;;  %v2756_v33 = vadd.f32 %v3791_v63, %v3190_v4 }
 0x752   :  { %v2751_v39 = vadd.f32 %v3190_v4, %v2750_v55 }
 0x754   :  { %v3794_v49 = vpop.f32.mrb[82].mxu0  ;;  %3827 = vmatprep.mubr.msk.f32.mxu1 %vm1392_vm3, %v2751_v39 }
 0x755   :  { %v2760_v27 = vpop.f32.mrb[83].mxu0  ;;  %3828 = vmatmul.mubr.msk.f32.vlgmr.msra.gmra.mrb[36].mxu1 %vm1392_vm3, %v2756_v33  ;;  %v2766_v6 = vadd.f32 %v3794_v49, %v3190_v4 }
 0x756   :  { %v2761_v26 = vadd.f32 %v3190_v4, %v2760_v27 }
 0x758   :  { %3830 = vmatprep.mubr.msk.f32.mxu1 %vm1392_vm3, %v2761_v26 }
 0x759   :  { %3831 = vmatmul.mubr.msk.f32.gmra.mrb[38].mxu1 %vm1392_vm3, %v2766_v6 }
 0x828   :  { %v3829_v31 = vpop.f32.mrb[36].mxu1 }
 0x829   :  { %v2919_v62 = vmul.f32 %v3829_v31, %v2915_v15  ;;  %v2895_v2 = vpop.f32.mrb[37].mxu1 }
 0x82a   :  { %v2918_v5 = vmul.f32 %v2914_v52, %v2895_v2 }
 0x82b   :  { %4293 = vtanh.f32 %v2919_v62 }
 0x82c   :  { %4295 = vtanh.f32 %v2918_v5  ;;  %v3832_v17 = vpop.f32.mrb[38].mxu1 }
 0x82d   :  { %v2921_v10 = vmul.f32 %v3832_v17, %v2917_v43  ;;  %v2905_v40 = vpop.f32.mrb[39].mxu1 }
 0x82e   :  { %v2920_v30 = vmul.f32 %v2916_v0, %v2905_v40 }
 0x82f   :  { %4297 = vtanh.f32 %v2921_v10 }
 0x830   :  { %4299 = vtanh.f32 %v2920_v30 }
 0x835   :  { %v4294_v23 = vpop.eup %4293 }
 0x836   :  { %v4296_v25 = vpop.eup %4295  ;;  %2927 = vst [vmem:[%s5865_s5 + $0x8] sm:$0xff] %v4294_v23 }
 0x837   :  { %2926 = vst [vmem:[%s5865_s5] sm:$0xff] %v4296_v25 }
 0x839   :  { %v4298_v59 = vpop.eup %4297 }
 0x83a   :  { %v4300_v50 = vpop.eup %4299  ;;  %2929 = vst [vmem:[%s5865_s5 + $0x18] sm:$0xff] %v4298_v59 }
 0x83b   :  { %2928 = vst [vmem:[%s5865_s5 + $0x10] sm:$0xff] %v4300_v50 }

</bundles_post_ra>
